<compile_context>
chip_gen: v7x
topology: tpu7x:2x2x1
jax: 0.10.0
libtpu: 0.0.40
codegen_flags: <defaults>
</compile_context>

<pallas_src>
import functools

import jax
import jax.numpy as jnp
from jax.experimental import pallas as pl
from jax.experimental.pallas import tpu as pltpu

LRELU_SLOPE = 0.2   # DIP blocks use nn.LeakyReLU(0.2)
GN_EPS = 1e-5       # torch.nn.GroupNorm default eps
NUM_GROUPS = 2


def _round_up(v, m):
    return ((v + m - 1) // m) * m


def _fused_block_kernel(x_ref, w1_ref, w2_ref, aff_ref, mask_ref, o_ref,
                        xflat2,
                        *, H, W, Cout, Cout_p, Lio, M, groups, eps, slope):
    """Fused [conv3x3 + GroupNorm + LeakyReLU] x 2 for one image.

    x_ref:    (Cin_p, SW)       bf16 flat padded frame (margins already zero)
    w1_ref:   (9, Cout_p, Cin_p)  bf16 layer-1 weight, one tile per tap
    w2_ref:   (9, Cout_p, Cout_p) bf16 layer-2 weight
    aff_ref:  (Cout_p, 6)       f32 columns: b1, g1, beta1, b2, g2, beta2
    mask_ref: (1, Lio)          f32, 1.0 on interior pixels of the padded frame
    o_ref:    (Cout_p, Lio)     f32 output (padded-frame layout; wrapper crops)
    xflat2:   (Cout_p, SW)      bf16 scratch: layer-1 activations + margins
    """
    Wp = W + 2
    mask = mask_ref[...]                                  # (1, Lio) f32

    def conv_gn_lrelu(flat_ref, w_ref, c0):
        # conv3x3 as 9 shifted-slice matmuls accumulated in f32 (no im2col slab;
        # bf16 operands hit the native MXU path on v5e/v6e/v7x).
        acc = None
        for k in range(9):
            ky, kx = divmod(k, 3)
            d = (ky - 1) * Wp + (kx - 1)
            xs = flat_ref[:, M + d:M + d + Lio]           # (C_p, Lio) bf16
            p = jnp.dot(w_ref[k], xs,
                        preferred_element_type=jnp.float32)
            acc = p if acc is None else acc + p           # (Cout_p, Lio) f32

        bias = aff_ref[:, c0 + 0:c0 + 1]                  # (Cout_p, 1) f32
        gamma = aff_ref[:, c0 + 1:c0 + 2]
        beta = aff_ref[:, c0 + 2:c0 + 3]
        acc = acc + bias

        # GroupNorm: single-pass sum / sum-sq (f32) over interior pixels of the
        # *real* channels; padded channels have zero weights/affine -> output 0.
        am = acc * mask                                   # masked acts, reused
        s = jnp.sum(am, axis=1, keepdims=True)
        sq = jnp.sum(am * am, axis=1, keepdims=True)
        cpg = Cout // groups
        ch = jax.lax.broadcasted_iota(jnp.int32, (Cout_p, 1), 0)
        cnt = float(cpg * H * W)
        mu_map = jnp.zeros((Cout_p, 1), jnp.float32)
        rstd_map = jnp.zeros((Cout_p, 1), jnp.float32)
        for g in range(groups):
            gm = (ch >= g * cpg) & (ch < (g + 1) * cpg)
            gs = jnp.sum(jnp.where(gm, s, 0.0))
            gsq = jnp.sum(jnp.where(gm, sq, 0.0))
            mu = gs / cnt
            var = gsq / cnt - mu * mu
            rstd = jax.lax.rsqrt(var + eps)
            mu_map = jnp.where(gm, mu, mu_map)
            rstd_map = jnp.where(gm, rstd, rstd_map)
        scale = rstd_map * gamma
        shift = beta - mu_map * scale
        y = acc * scale + shift
        y = jnp.maximum(y, slope * y)                     # LeakyReLU (slope>0)
        return y * mask                                   # zero frame border / lane pad

    # ---- layer 1: input block already carries zero margins + zero padding ----
    y1 = conv_gn_lrelu(x_ref, w1_ref, 0)

    # ---- layer 2: activations never leave VMEM.  Only the margin strips need
    # zeroing; done per image (cheap: 2*M lanes) and megacore-safe, unlike a
    # pl.when(program_id==0) one-shot which would miss the second core's scratch.
    xflat2[:, :M] = jnp.zeros((Cout_p, M), xflat2.dtype)
    xflat2[:, M + Lio:M + Lio + M] = jnp.zeros((Cout_p, M), xflat2.dtype)
    xflat2[:, M:M + Lio] = y1.astype(xflat2.dtype)
    y2 = conv_gn_lrelu(xflat2, w2_ref, 3)

    o_ref[...] = y2


def bayesianise_block_forward(x_nchw, params):
    """forward(x) of BayesianiseBlock; NCHW in / NCHW out (PyTorch convention)."""
    N, Cin, H, W = x_nchw.shape
    Cout = params["w1"].shape[-1]
    assert Cout % NUM_GROUPS == 0, "GroupNorm requires Cout % num_groups == 0"

    Cin_p = _round_up(Cin, 8)        # pad channels to 8 sublanes (zero channels)
    Cout_p = _round_up(Cout, 8)
    Hp, Wp = H + 2, W + 2
    Lp = Hp * Wp
    Lio = _round_up(Lp, 256)         # lane-aligned I/O width (256 = v6e/v7x MXU)
    M = _round_up(Wp + 1, 128)       # side margin covering all tap offsets
    SW = M + Lio + M                 # flat frame width incl. margins

    # Build the full layer-1 flat frame on the host side: spatial pad once,
    # flatten, lane-align, add zero margins, pad channels, cast to bf16.
    xp = jnp.pad(x_nchw, ((0, 0), (0, Cin_p - Cin), (1, 1), (1, 1)))
    xp = xp.reshape(N, Cin_p, Lp)
    xp = jnp.pad(xp, ((0, 0), (0, 0), (M, SW - M - Lp))).astype(jnp.bfloat16)

    # Weights as (9, Cout_p, C_p): one clean MXU tile per tap, bf16.
    def prep_w(w, ci, ci_p):
        w = jnp.pad(w, ((0, 0), (0, 0), (0, ci_p - ci), (0, Cout_p - Cout)))
        w = w.reshape(9, ci_p, Cout_p)
        return jnp.transpose(w, (0, 2, 1)).astype(jnp.bfloat16)

    w1 = prep_w(params["w1"], Cin, Cin_p)
    w2 = prep_w(params["w2"], Cout, Cout_p)

    # bias/gamma/beta of both layers packed into one (Cout_p, 6) f32 array;
    # padded channels get zero affine params (-> identically zero activations).
    def padc(v):
        return jnp.pad(v, (0, Cout_p - Cout))

    aff = jnp.stack([padc(params["b1"]), padc(params["g1"]), padc(params["beta1"]),
                     padc(params["b2"]), padc(params["g2"]), padc(params["beta2"])],
                    axis=1).astype(jnp.float32)

    # Interior-pixel mask of the flattened padded frame (built once, host side).
    q = jnp.arange(Lio)
    r, c = q // Wp, q % Wp
    mask = ((r >= 1) & (r <= H) & (c >= 1) & (c <= W) & (q < Lp))
    mask = mask.astype(jnp.float32).reshape(1, Lio)

    kern = functools.partial(_fused_block_kernel, H=H, W=W, Cout=Cout,
                             Cout_p=Cout_p, Lio=Lio, M=M, groups=NUM_GROUPS,
                             eps=GN_EPS, slope=LRELU_SLOPE)

    # Per-generation VMEM budget (v5e/v6e ~128 MiB, v7x ~64 MiB physical).
    try:
        vmem_cap = int(pltpu.get_tpu_info().vmem_capacity_bytes)
    except Exception:
        vmem_cap = 64 * 1024 * 1024
    budget = int(0.85 * vmem_cap)
    est = (2 * Cin_p * SW * 2                                  # input blocks (bf16, x2 buf)
           + 2 * Cout_p * Lio * 4                              # output blocks (f32, x2 buf)
           + 2 * 9 * Cout_p * (Cin_p + Cout_p) * 2             # weights (bf16, x2 buf)
           + 2 * (Cout_p * 6 + Lio) * 4                        # aff + mask blocks
           + Cout_p * SW * 2                                   # xflat2 scratch (bf16)
           + 6 * Cout_p * Lio * 4)                             # compiler temps (acc/am/y/...)
    vmem_limit = int(min(budget, max(16 * 1024 * 1024, 2 * est)))

    out = pl.pallas_call(
        kern,
        out_shape=jax.ShapeDtypeStruct((N, Cout_p, Lio), jnp.float32),
        grid=(N,),
        in_specs=[
            pl.BlockSpec((None, Cin_p, SW), lambda n: (n, 0, 0)),
            pl.BlockSpec((9, Cout_p, Cin_p), lambda n: (0, 0, 0)),
            pl.BlockSpec((9, Cout_p, Cout_p), lambda n: (0, 0, 0)),
            pl.BlockSpec((Cout_p, 6), lambda n: (0, 0)),
            pl.BlockSpec((1, Lio), lambda n: (0, 0)),
        ],
        out_specs=pl.BlockSpec((None, Cout_p, Lio), lambda n: (n, 0, 0)),
        scratch_shapes=[
            pltpu.VMEM((Cout_p, SW), jnp.bfloat16),
        ],
        compiler_params=pltpu.CompilerParams(
            dimension_semantics=("parallel",),
            vmem_limit_bytes=vmem_limit),
    )(xp, w1, w2, aff, mask)

    # Crop the padded-frame layout back to (N, Cout, H, W).
    out = out[:, :Cout, :Lp].reshape(N, Cout, Hp, Wp)[:, :, 1:H + 1, 1:W + 1]
    return out


def init_block_params(key, cin, cout):
    """Deterministic synthetic parameters (shapes match the wrapped block)."""
    k = jax.random.split(key, 8)
    s1 = 1.0 / jnp.sqrt(cin * 9.0)
    s2 = 1.0 / jnp.sqrt(cout * 9.0)
    return {
        "w1": jax.random.uniform(k[0], (3, 3, cin, cout), jnp.float32, -s1, s1),
        "b1": jax.random.uniform(k[1], (cout,), jnp.float32, -s1, s1),
        "g1": 1.0 + 0.1 * jax.random.normal(k[2], (cout,), jnp.float32),
        "beta1": 0.1 * jax.random.normal(k[3], (cout,), jnp.float32),
        "w2": jax.random.uniform(k[4], (3, 3, cout, cout), jnp.float32, -s2, s2),
        "b2": jax.random.uniform(k[5], (cout,), jnp.float32, -s2, s2),
        "g2": 1.0 + 0.1 * jax.random.normal(k[6], (cout,), jnp.float32),
        "beta2": 0.1 * jax.random.normal(k[7], (cout,), jnp.float32),
    }


# ---------------- pure-JAX reference (for correctness check) ----------------
def _ref_layer(x_nhwc, w_hwio, bias, gamma, beta, groups, eps, slope, mm_dtype):
    y = jax.lax.conv_general_dilated(
        x_nhwc.astype(mm_dtype), w_hwio.astype(mm_dtype),
        window_strides=(1, 1), padding=((1, 1), (1, 1)),
        dimension_numbers=("NHWC", "HWIO", "NHWC"),
        preferred_element_type=jnp.float32) + bias
    N, H, W, C = y.shape
    yg = y.reshape(N, H, W, groups, C // groups)
    mu = jnp.mean(yg, axis=(1, 2, 4), keepdims=True)
    var = jnp.mean((yg - mu) ** 2, axis=(1, 2, 4), keepdims=True)
    yg = (yg - mu) * jax.lax.rsqrt(var + eps)
    y = yg.reshape(N, H, W, C) * gamma + beta
    return jnp.where(y >= 0, y, slope * y)


def _ref_forward(x_nchw, params, mm_dtype=jnp.float32):
    x = jnp.transpose(x_nchw, (0, 2, 3, 1))
    x = _ref_layer(x, params["w1"], params["b1"], params["g1"], params["beta1"],
                   NUM_GROUPS, GN_EPS, LRELU_SLOPE, mm_dtype)
    x = _ref_layer(x, params["w2"], params["b2"], params["g2"], params["beta2"],
                   NUM_GROUPS, GN_EPS, LRELU_SLOPE, mm_dtype)
    return jnp.transpose(x, (0, 3, 1, 2))


if __name__ == "__main__":
    key = jax.random.PRNGKey(0)
    kx, kp = jax.random.split(key)
    N, C, Hs, Ws = 2, 4, 16, 16
    x = jax.random.normal(kx, (N, C, Hs, Ws), jnp.float32)
    params = init_block_params(kp, C, C)

    out = jax.block_until_ready(bayesianise_block_forward(x, params))
    ref_bf16 = jax.block_until_ready(_ref_forward(x, params, jnp.bfloat16))
    ref_f32 = jax.block_until_ready(_ref_forward(x, params, jnp.float32))

    assert out.shape == (N, C, Hs, Ws), out.shape
    # Strict check vs a reference with identical (bf16-operand, f32-accum) conv
    # numerics; loose sanity check vs the full-f32 PyTorch-equivalent reference.
    err_strict = float(jnp.max(jnp.abs(out - ref_bf16)))
    err_f32 = float(jnp.max(jnp.abs(out - ref_f32)))
    assert err_strict < 2e-3, ("vs bf16-matmul reference", err_strict)
    assert err_f32 < 1e-1, ("vs f32 reference", err_f32)
    print("KERNEL_OK")
</pallas_src>

<mosaic_0001>
module attributes {stable_mosaic.version = 11 : i64} {
  func.func @_fused_block_kernel(%arg0: i32, %arg1: memref<1x8x768xbf16, #tpu.memory_space<vmem>>, %arg2: memref<9x8x8xbf16, #tpu.memory_space<vmem>>, %arg3: memref<9x8x8xbf16, #tpu.memory_space<vmem>>, %arg4: memref<8x6xf32, #tpu.memory_space<vmem>>, %arg5: memref<1x512xf32, #tpu.memory_space<vmem>>, %arg6: memref<1x8x512xf32, #tpu.memory_space<vmem>>, %arg7: memref<8x768xbf16, #tpu.memory_space<vmem>>) attributes {dimension_semantics = [#tpu.dimension_semantics<parallel>], iteration_bounds = array<i64: 2>, scalar_prefetch = 0 : i64, scratch_operands = 1 : i64, tpu.core_type = #tpu.core_type<tc>, window_params = [{transform_indices = @transform_0, window_bounds = array<i64: 1, 8, 768>}, {pipeline_mode = #tpu.pipeline_mode<synchronous>, transform_indices = @transform_1, window_bounds = array<i64: 9, 8, 8>}, {pipeline_mode = #tpu.pipeline_mode<synchronous>, transform_indices = @transform_2, window_bounds = array<i64: 9, 8, 8>}, {pipeline_mode = #tpu.pipeline_mode<synchronous>, transform_indices = @transform_3, window_bounds = array<i64: 8, 6>}, {pipeline_mode = #tpu.pipeline_mode<synchronous>, transform_indices = @transform_4, window_bounds = array<i64: 1, 512>}, {transform_indices = @transform_5, window_bounds = array<i64: 1, 8, 512>}]} {
    %c0 = arith.constant 0 : index
    %c0_0 = arith.constant 0 : index
    %0 = vector.load %arg5[%c0, %c0_0] : memref<1x512xf32, #tpu.memory_space<vmem>>, vector<1x512xf32>
    %c0_1 = arith.constant 0 : index
    %c0_2 = arith.constant 0 : index
    %c109 = arith.constant 109 : index
    %1 = vector.load %arg1[%c0_1, %c0_2, %c109] : memref<1x8x768xbf16, #tpu.memory_space<vmem>>, vector<1x8x512xbf16>
    %2 = vector.shape_cast %1 : vector<1x8x512xbf16> to vector<8x512xbf16>
    %c0_3 = arith.constant 0 : index
    %c0_4 = arith.constant 0 : index
    %c0_5 = arith.constant 0 : index
    %3 = vector.load %arg2[%c0_3, %c0_4, %c0_5] : memref<9x8x8xbf16, #tpu.memory_space<vmem>>, vector<1x8x8xbf16>
    %4 = vector.shape_cast %3 : vector<1x8x8xbf16> to vector<8x8xbf16>
    %cst = arith.constant dense<0.000000e+00> : vector<8x512xf32>
    %5 = tpu.matmul %4, %2, %cst {dimension_numbers = #tpu.dot_dimension_numbers<[1], [0], [0], [1], [0, 0, 1, 1], [], []>} : vector<8x8xbf16>, vector<8x512xbf16>, vector<8x512xf32> -> vector<8x512xf32>
    %c0_6 = arith.constant 0 : index
    %c0_7 = arith.constant 0 : index
    %c110 = arith.constant 110 : index
    %6 = vector.load %arg1[%c0_6, %c0_7, %c110] : memref<1x8x768xbf16, #tpu.memory_space<vmem>>, vector<1x8x512xbf16>
    %7 = vector.shape_cast %6 : vector<1x8x512xbf16> to vector<8x512xbf16>
    %c1 = arith.constant 1 : index
    %c0_8 = arith.constant 0 : index
    %c0_9 = arith.constant 0 : index
    %8 = vector.load %arg2[%c1, %c0_8, %c0_9] : memref<9x8x8xbf16, #tpu.memory_space<vmem>>, vector<1x8x8xbf16>
    %9 = vector.shape_cast %8 : vector<1x8x8xbf16> to vector<8x8xbf16>
    %cst_10 = arith.constant dense<0.000000e+00> : vector<8x512xf32>
    %10 = tpu.matmul %9, %7, %cst_10 {dimension_numbers = #tpu.dot_dimension_numbers<[1], [0], [0], [1], [0, 0, 1, 1], [], []>} : vector<8x8xbf16>, vector<8x512xbf16>, vector<8x512xf32> -> vector<8x512xf32>
    %11 = arith.addf %5, %10 : vector<8x512xf32>
    %c0_11 = arith.constant 0 : index
    %c0_12 = arith.constant 0 : index
    %c111 = arith.constant 111 : index
    %12 = vector.load %arg1[%c0_11, %c0_12, %c111] : memref<1x8x768xbf16, #tpu.memory_space<vmem>>, vector<1x8x512xbf16>
    %13 = vector.shape_cast %12 : vector<1x8x512xbf16> to vector<8x512xbf16>
    %c2 = arith.constant 2 : index
    %c0_13 = arith.constant 0 : index
    %c0_14 = arith.constant 0 : index
    %14 = vector.load %arg2[%c2, %c0_13, %c0_14] : memref<9x8x8xbf16, #tpu.memory_space<vmem>>, vector<1x8x8xbf16>
    %15 = vector.shape_cast %14 : vector<1x8x8xbf16> to vector<8x8xbf16>
    %cst_15 = arith.constant dense<0.000000e+00> : vector<8x512xf32>
    %16 = tpu.matmul %15, %13, %cst_15 {dimension_numbers = #tpu.dot_dimension_numbers<[1], [0], [0], [1], [0, 0, 1, 1], [], []>} : vector<8x8xbf16>, vector<8x512xbf16>, vector<8x512xf32> -> vector<8x512xf32>
    %17 = arith.addf %11, %16 : vector<8x512xf32>
    %c0_16 = arith.constant 0 : index
    %c0_17 = arith.constant 0 : index
    %c127 = arith.constant 127 : index
    %18 = vector.load %arg1[%c0_16, %c0_17, %c127] : memref<1x8x768xbf16, #tpu.memory_space<vmem>>, vector<1x8x512xbf16>
    %19 = vector.shape_cast %18 : vector<1x8x512xbf16> to vector<8x512xbf16>
    %c3 = arith.constant 3 : index
    %c0_18 = arith.constant 0 : index
    %c0_19 = arith.constant 0 : index
    %20 = vector.load %arg2[%c3, %c0_18, %c0_19] : memref<9x8x8xbf16, #tpu.memory_space<vmem>>, vector<1x8x8xbf16>
    %21 = vector.shape_cast %20 : vector<1x8x8xbf16> to vector<8x8xbf16>
    %cst_20 = arith.constant dense<0.000000e+00> : vector<8x512xf32>
    %22 = tpu.matmul %21, %19, %cst_20 {dimension_numbers = #tpu.dot_dimension_numbers<[1], [0], [0], [1], [0, 0, 1, 1], [], []>} : vector<8x8xbf16>, vector<8x512xbf16>, vector<8x512xf32> -> vector<8x512xf32>
    %23 = arith.addf %17, %22 : vector<8x512xf32>
    %c0_21 = arith.constant 0 : index
    %c0_22 = arith.constant 0 : index
    %c128 = arith.constant 128 : index
    %24 = vector.load %arg1[%c0_21, %c0_22, %c128] : memref<1x8x768xbf16, #tpu.memory_space<vmem>>, vector<1x8x512xbf16>
    %25 = vector.shape_cast %24 : vector<1x8x512xbf16> to vector<8x512xbf16>
    %c4 = arith.constant 4 : index
    %c0_23 = arith.constant 0 : index
    %c0_24 = arith.constant 0 : index
    %26 = vector.load %arg2[%c4, %c0_23, %c0_24] : memref<9x8x8xbf16, #tpu.memory_space<vmem>>, vector<1x8x8xbf16>
    %27 = vector.shape_cast %26 : vector<1x8x8xbf16> to vector<8x8xbf16>
    %cst_25 = arith.constant dense<0.000000e+00> : vector<8x512xf32>
    %28 = tpu.matmul %27, %25, %cst_25 {dimension_numbers = #tpu.dot_dimension_numbers<[1], [0], [0], [1], [0, 0, 1, 1], [], []>} : vector<8x8xbf16>, vector<8x512xbf16>, vector<8x512xf32> -> vector<8x512xf32>
    %29 = arith.addf %23, %28 : vector<8x512xf32>
    %c0_26 = arith.constant 0 : index
    %c0_27 = arith.constant 0 : index
    %c129 = arith.constant 129 : index
    %30 = vector.load %arg1[%c0_26, %c0_27, %c129] : memref<1x8x768xbf16, #tpu.memory_space<vmem>>, vector<1x8x512xbf16>
    %31 = vector.shape_cast %30 : vector<1x8x512xbf16> to vector<8x512xbf16>
    %c5 = arith.constant 5 : index
    %c0_28 = arith.constant 0 : index
    %c0_29 = arith.constant 0 : index
    %32 = vector.load %arg2[%c5, %c0_28, %c0_29] : memref<9x8x8xbf16, #tpu.memory_space<vmem>>, vector<1x8x8xbf16>
    %33 = vector.shape_cast %32 : vector<1x8x8xbf16> to vector<8x8xbf16>
    %cst_30 = arith.constant dense<0.000000e+00> : vector<8x512xf32>
    %34 = tpu.matmul %33, %31, %cst_30 {dimension_numbers = #tpu.dot_dimension_numbers<[1], [0], [0], [1], [0, 0, 1, 1], [], []>} : vector<8x8xbf16>, vector<8x512xbf16>, vector<8x512xf32> -> vector<8x512xf32>
    %35 = arith.addf %29, %34 : vector<8x512xf32>
    %c0_31 = arith.constant 0 : index
    %c0_32 = arith.constant 0 : index
    %c145 = arith.constant 145 : index
    %36 = vector.load %arg1[%c0_31, %c0_32, %c145] : memref<1x8x768xbf16, #tpu.memory_space<vmem>>, vector<1x8x512xbf16>
    %37 = vector.shape_cast %36 : vector<1x8x512xbf16> to vector<8x512xbf16>
    %c6 = arith.constant 6 : index
    %c0_33 = arith.constant 0 : index
    %c0_34 = arith.constant 0 : index
    %38 = vector.load %arg2[%c6, %c0_33, %c0_34] : memref<9x8x8xbf16, #tpu.memory_space<vmem>>, vector<1x8x8xbf16>
    %39 = vector.shape_cast %38 : vector<1x8x8xbf16> to vector<8x8xbf16>
    %cst_35 = arith.constant dense<0.000000e+00> : vector<8x512xf32>
    %40 = tpu.matmul %39, %37, %cst_35 {dimension_numbers = #tpu.dot_dimension_numbers<[1], [0], [0], [1], [0, 0, 1, 1], [], []>} : vector<8x8xbf16>, vector<8x512xbf16>, vector<8x512xf32> -> vector<8x512xf32>
    %41 = arith.addf %35, %40 : vector<8x512xf32>
    %c0_36 = arith.constant 0 : index
    %c0_37 = arith.constant 0 : index
    %c146 = arith.constant 146 : index
    %42 = vector.load %arg1[%c0_36, %c0_37, %c146] : memref<1x8x768xbf16, #tpu.memory_space<vmem>>, vector<1x8x512xbf16>
    %43 = vector.shape_cast %42 : vector<1x8x512xbf16> to vector<8x512xbf16>
    %c7 = arith.constant 7 : index
    %c0_38 = arith.constant 0 : index
    %c0_39 = arith.constant 0 : index
    %44 = vector.load %arg2[%c7, %c0_38, %c0_39] : memref<9x8x8xbf16, #tpu.memory_space<vmem>>, vector<1x8x8xbf16>
    %45 = vector.shape_cast %44 : vector<1x8x8xbf16> to vector<8x8xbf16>
    %cst_40 = arith.constant dense<0.000000e+00> : vector<8x512xf32>
    %46 = tpu.matmul %45, %43, %cst_40 {dimension_numbers = #tpu.dot_dimension_numbers<[1], [0], [0], [1], [0, 0, 1, 1], [], []>} : vector<8x8xbf16>, vector<8x512xbf16>, vector<8x512xf32> -> vector<8x512xf32>
    %47 = arith.addf %41, %46 : vector<8x512xf32>
    %c0_41 = arith.constant 0 : index
    %c0_42 = arith.constant 0 : index
    %c147 = arith.constant 147 : index
    %48 = vector.load %arg1[%c0_41, %c0_42, %c147] : memref<1x8x768xbf16, #tpu.memory_space<vmem>>, vector<1x8x512xbf16>
    %49 = vector.shape_cast %48 : vector<1x8x512xbf16> to vector<8x512xbf16>
    %c8 = arith.constant 8 : index
    %c0_43 = arith.constant 0 : index
    %c0_44 = arith.constant 0 : index
    %50 = vector.load %arg2[%c8, %c0_43, %c0_44] : memref<9x8x8xbf16, #tpu.memory_space<vmem>>, vector<1x8x8xbf16>
    %51 = vector.shape_cast %50 : vector<1x8x8xbf16> to vector<8x8xbf16>
    %cst_45 = arith.constant dense<0.000000e+00> : vector<8x512xf32>
    %52 = tpu.matmul %51, %49, %cst_45 {dimension_numbers = #tpu.dot_dimension_numbers<[1], [0], [0], [1], [0, 0, 1, 1], [], []>} : vector<8x8xbf16>, vector<8x512xbf16>, vector<8x512xf32> -> vector<8x512xf32>
    %53 = arith.addf %47, %52 : vector<8x512xf32>
    %c0_46 = arith.constant 0 : index
    %c0_47 = arith.constant 0 : index
    %54 = vector.load %arg4[%c0_46, %c0_47] : memref<8x6xf32, #tpu.memory_space<vmem>>, vector<8x1xf32>
    %c0_48 = arith.constant 0 : index
    %c1_49 = arith.constant 1 : index
    %55 = vector.load %arg4[%c0_48, %c1_49] : memref<8x6xf32, #tpu.memory_space<vmem>>, vector<8x1xf32>
    %c0_50 = arith.constant 0 : index
    %c2_51 = arith.constant 2 : index
    %56 = vector.load %arg4[%c0_50, %c2_51] : memref<8x6xf32, #tpu.memory_space<vmem>>, vector<8x1xf32>
    %57 = vector.broadcast %54 : vector<8x1xf32> to vector<8x512xf32>
    %58 = arith.addf %53, %57 : vector<8x512xf32>
    %59 = vector.broadcast %0 : vector<1x512xf32> to vector<8x512xf32>
    %60 = arith.mulf %58, %59 : vector<8x512xf32>
    %cst_52 = arith.constant dense<0.000000e+00> : vector<8xf32>
    %61 = vector.multi_reduction <add>, %60, %cst_52 [1] : vector<8x512xf32> to vector<8xf32>
    %62 = vector.shape_cast %61 : vector<8xf32> to vector<8x1xf32>
    %63 = arith.mulf %60, %60 : vector<8x512xf32>
    %cst_53 = arith.constant dense<0.000000e+00> : vector<8xf32>
    %64 = vector.multi_reduction <add>, %63, %cst_53 [1] : vector<8x512xf32> to vector<8xf32>
    %65 = vector.shape_cast %64 : vector<8xf32> to vector<8x1xf32>
    %66 = tpu.iota {dimensions = array<i32: 0>} : vector<8x1xi32>
    %cst_54 = arith.constant 0.000000e+00 : f32
    %67 = vector.broadcast %cst_54 : f32 to vector<8x1xf32>
    %cst_55 = arith.constant 0.000000e+00 : f32
    %68 = vector.broadcast %cst_55 : f32 to vector<8x1xf32>
    %c0_i32 = arith.constant 0 : i32
    %69 = vector.broadcast %c0_i32 : i32 to vector<8x1xi32>
    %70 = arith.cmpi sge, %66, %69 : vector<8x1xi32>
    %c2_i32 = arith.constant 2 : i32
    %71 = vector.broadcast %c2_i32 : i32 to vector<8x1xi32>
    %72 = arith.cmpi slt, %66, %71 : vector<8x1xi32>
    %73 = arith.andi %70, %72 : vector<8x1xi1>
    %cst_56 = arith.constant 0.000000e+00 : f32
    %74 = vector.broadcast %cst_56 : f32 to vector<8x1xf32>
    %75 = arith.select %73, %62, %74 : vector<8x1xi1>, vector<8x1xf32>
    %76 = vector.shape_cast %75 : vector<8x1xf32> to vector<1x8x1xf32>
    %cst_57 = arith.constant dense<0.000000e+00> : vector<1xf32>
    %77 = vector.multi_reduction <add>, %76, %cst_57 [1, 2] : vector<1x8x1xf32> to vector<1xf32>
    %78 = vector.shape_cast %77 : vector<1xf32> to vector<1x1x1xf32>
    %79 = vector.extract %78[0, 0, 0] : f32 from vector<1x1x1xf32>
    %cst_58 = arith.constant 0.000000e+00 : f32
    %80 = vector.broadcast %cst_58 : f32 to vector<8x1xf32>
    %81 = arith.select %73, %65, %80 : vector<8x1xi1>, vector<8x1xf32>
    %82 = vector.shape_cast %81 : vector<8x1xf32> to vector<1x8x1xf32>
    %cst_59 = arith.constant dense<0.000000e+00> : vector<1xf32>
    %83 = vector.multi_reduction <add>, %82, %cst_59 [1, 2] : vector<1x8x1xf32> to vector<1xf32>
    %84 = vector.shape_cast %83 : vector<1xf32> to vector<1x1x1xf32>
    %85 = vector.extract %84[0, 0, 0] : f32 from vector<1x1x1xf32>
    %cst_60 = arith.constant 5.120000e+02 : f32
    %86 = arith.divf %79, %cst_60 : f32
    %cst_61 = arith.constant 5.120000e+02 : f32
    %87 = arith.divf %85, %cst_61 : f32
    %88 = arith.mulf %86, %86 : f32
    %89 = arith.subf %87, %88 : f32
    %cst_62 = arith.constant 9.99999974E-6 : f32
    %90 = arith.addf %89, %cst_62 : f32
    %91 = math.rsqrt %90 : f32
    %92 = vector.broadcast %86 : f32 to vector<8x1xf32>
    %93 = arith.select %73, %92, %67 : vector<8x1xi1>, vector<8x1xf32>
    %94 = vector.broadcast %91 : f32 to vector<8x1xf32>
    %95 = arith.select %73, %94, %68 : vector<8x1xi1>, vector<8x1xf32>
    %c2_i32_63 = arith.constant 2 : i32
    %96 = vector.broadcast %c2_i32_63 : i32 to vector<8x1xi32>
    %97 = arith.cmpi sge, %66, %96 : vector<8x1xi32>
    %c4_i32 = arith.constant 4 : i32
    %98 = vector.broadcast %c4_i32 : i32 to vector<8x1xi32>
    %99 = arith.cmpi slt, %66, %98 : vector<8x1xi32>
    %100 = arith.andi %97, %99 : vector<8x1xi1>
    %cst_64 = arith.constant 0.000000e+00 : f32
    %101 = vector.broadcast %cst_64 : f32 to vector<8x1xf32>
    %102 = arith.select %100, %62, %101 : vector<8x1xi1>, vector<8x1xf32>
    %103 = vector.shape_cast %102 : vector<8x1xf32> to vector<1x8x1xf32>
    %cst_65 = arith.constant dense<0.000000e+00> : vector<1xf32>
    %104 = vector.multi_reduction <add>, %103, %cst_65 [1, 2] : vector<1x8x1xf32> to vector<1xf32>
    %105 = vector.shape_cast %104 : vector<1xf32> to vector<1x1x1xf32>
    %106 = vector.extract %105[0, 0, 0] : f32 from vector<1x1x1xf32>
    %cst_66 = arith.constant 0.000000e+00 : f32
    %107 = vector.broadcast %cst_66 : f32 to vector<8x1xf32>
    %108 = arith.select %100, %65, %107 : vector<8x1xi1>, vector<8x1xf32>
    %109 = vector.shape_cast %108 : vector<8x1xf32> to vector<1x8x1xf32>
    %cst_67 = arith.constant dense<0.000000e+00> : vector<1xf32>
    %110 = vector.multi_reduction <add>, %109, %cst_67 [1, 2] : vector<1x8x1xf32> to vector<1xf32>
    %111 = vector.shape_cast %110 : vector<1xf32> to vector<1x1x1xf32>
    %112 = vector.extract %111[0, 0, 0] : f32 from vector<1x1x1xf32>
    %cst_68 = arith.constant 5.120000e+02 : f32
    %113 = arith.divf %106, %cst_68 : f32
    %cst_69 = arith.constant 5.120000e+02 : f32
    %114 = arith.divf %112, %cst_69 : f32
    %115 = arith.mulf %113, %113 : f32
    %116 = arith.subf %114, %115 : f32
    %cst_70 = arith.constant 9.99999974E-6 : f32
    %117 = arith.addf %116, %cst_70 : f32
    %118 = math.rsqrt %117 : f32
    %119 = vector.broadcast %113 : f32 to vector<8x1xf32>
    %120 = arith.select %100, %119, %93 : vector<8x1xi1>, vector<8x1xf32>
    %121 = vector.broadcast %118 : f32 to vector<8x1xf32>
    %122 = arith.select %100, %121, %95 : vector<8x1xi1>, vector<8x1xf32>
    %123 = arith.mulf %122, %55 : vector<8x1xf32>
    %124 = arith.mulf %120, %123 : vector<8x1xf32>
    %125 = arith.subf %56, %124 : vector<8x1xf32>
    %126 = vector.broadcast %123 : vector<8x1xf32> to vector<8x512xf32>
    %127 = arith.mulf %58, %126 : vector<8x512xf32>
    %128 = vector.broadcast %125 : vector<8x1xf32> to vector<8x512xf32>
    %129 = arith.addf %127, %128 : vector<8x512xf32>
    %cst_71 = arith.constant 2.000000e-01 : f32
    %130 = vector.broadcast %cst_71 : f32 to vector<8x512xf32>
    %131 = arith.mulf %130, %129 : vector<8x512xf32>
    %132 = arith.maximumf %129, %131 : vector<8x512xf32>
    %133 = vector.broadcast %0 : vector<1x512xf32> to vector<8x512xf32>
    %134 = arith.mulf %132, %133 : vector<8x512xf32>
    %cst_72 = arith.constant 0.000000e+00 : bf16
    %135 = vector.broadcast %cst_72 : bf16 to vector<8x128xbf16>
    %c0_73 = arith.constant 0 : index
    %c0_74 = arith.constant 0 : index
    %136 = vector.load %arg7[%c0_73, %c0_74] : memref<8x768xbf16, #tpu.memory_space<vmem>>, vector<8x128xbf16>
    tpu.vector_store %arg7[%c0_73, %c0_74], %135 {strides = array<i32>} : memref<8x768xbf16, #tpu.memory_space<vmem>>, vector<8x128xbf16>,
    %cst_75 = arith.constant 0.000000e+00 : bf16
    %137 = vector.broadcast %cst_75 : bf16 to vector<8x128xbf16>
    %c0_76 = arith.constant 0 : index
    %c640 = arith.constant 640 : index
    %138 = vector.load %arg7[%c0_76, %c640] : memref<8x768xbf16, #tpu.memory_space<vmem>>, vector<8x128xbf16>
    tpu.vector_store %arg7[%c0_76, %c640], %137 {strides = array<i32>} : memref<8x768xbf16, #tpu.memory_space<vmem>>, vector<8x128xbf16>,
    %139 = arith.truncf %134 : vector<8x512xf32> to vector<8x512xbf16>
    %c0_77 = arith.constant 0 : index
    %c128_78 = arith.constant 128 : index
    %140 = vector.load %arg7[%c0_77, %c128_78] : memref<8x768xbf16, #tpu.memory_space<vmem>>, vector<8x512xbf16>
    tpu.vector_store %arg7[%c0_77, %c128_78], %139 {strides = array<i32>} : memref<8x768xbf16, #tpu.memory_space<vmem>>, vector<8x512xbf16>,
    %c0_79 = arith.constant 0 : index
    %c109_80 = arith.constant 109 : index
    %141 = vector.load %arg7[%c0_79, %c109_80] : memref<8x768xbf16, #tpu.memory_space<vmem>>, vector<8x512xbf16>
    %c0_81 = arith.constant 0 : index
    %c0_82 = arith.constant 0 : index
    %c0_83 = arith.constant 0 : index
    %142 = vector.load %arg3[%c0_81, %c0_82, %c0_83] : memref<9x8x8xbf16, #tpu.memory_space<vmem>>, vector<1x8x8xbf16>
    %143 = vector.shape_cast %142 : vector<1x8x8xbf16> to vector<8x8xbf16>
    %cst_84 = arith.constant dense<0.000000e+00> : vector<8x512xf32>
    %144 = tpu.matmul %143, %141, %cst_84 {dimension_numbers = #tpu.dot_dimension_numbers<[1], [0], [0], [1], [0, 0, 1, 1], [], []>} : vector<8x8xbf16>, vector<8x512xbf16>, vector<8x512xf32> -> vector<8x512xf32>
    %c0_85 = arith.constant 0 : index
    %c110_86 = arith.constant 110 : index
    %145 = vector.load %arg7[%c0_85, %c110_86] : memref<8x768xbf16, #tpu.memory_space<vmem>>, vector<8x512xbf16>
    %c1_87 = arith.constant 1 : index
    %c0_88 = arith.constant 0 : index
    %c0_89 = arith.constant 0 : index
    %146 = vector.load %arg3[%c1_87, %c0_88, %c0_89] : memref<9x8x8xbf16, #tpu.memory_space<vmem>>, vector<1x8x8xbf16>
    %147 = vector.shape_cast %146 : vector<1x8x8xbf16> to vector<8x8xbf16>
    %cst_90 = arith.constant dense<0.000000e+00> : vector<8x512xf32>
    %148 = tpu.matmul %147, %145, %cst_90 {dimension_numbers = #tpu.dot_dimension_numbers<[1], [0], [0], [1], [0, 0, 1, 1], [], []>} : vector<8x8xbf16>, vector<8x512xbf16>, vector<8x512xf32> -> vector<8x512xf32>
    %149 = arith.addf %144, %148 : vector<8x512xf32>
    %c0_91 = arith.constant 0 : index
    %c111_92 = arith.constant 111 : index
    %150 = vector.load %arg7[%c0_91, %c111_92] : memref<8x768xbf16, #tpu.memory_space<vmem>>, vector<8x512xbf16>
    %c2_93 = arith.constant 2 : index
    %c0_94 = arith.constant 0 : index
    %c0_95 = arith.constant 0 : index
    %151 = vector.load %arg3[%c2_93, %c0_94, %c0_95] : memref<9x8x8xbf16, #tpu.memory_space<vmem>>, vector<1x8x8xbf16>
    %152 = vector.shape_cast %151 : vector<1x8x8xbf16> to vector<8x8xbf16>
    %cst_96 = arith.constant dense<0.000000e+00> : vector<8x512xf32>
    %153 = tpu.matmul %152, %150, %cst_96 {dimension_numbers = #tpu.dot_dimension_numbers<[1], [0], [0], [1], [0, 0, 1, 1], [], []>} : vector<8x8xbf16>, vector<8x512xbf16>, vector<8x512xf32> -> vector<8x512xf32>
    %154 = arith.addf %149, %153 : vector<8x512xf32>
    %c0_97 = arith.constant 0 : index
    %c127_98 = arith.constant 127 : index
    %155 = vector.load %arg7[%c0_97, %c127_98] : memref<8x768xbf16, #tpu.memory_space<vmem>>, vector<8x512xbf16>
    %c3_99 = arith.constant 3 : index
    %c0_100 = arith.constant 0 : index
    %c0_101 = arith.constant 0 : index
    %156 = vector.load %arg3[%c3_99, %c0_100, %c0_101] : memref<9x8x8xbf16, #tpu.memory_space<vmem>>, vector<1x8x8xbf16>
    %157 = vector.shape_cast %156 : vector<1x8x8xbf16> to vector<8x8xbf16>
    %cst_102 = arith.constant dense<0.000000e+00> : vector<8x512xf32>
    %158 = tpu.matmul %157, %155, %cst_102 {dimension_numbers = #tpu.dot_dimension_numbers<[1], [0], [0], [1], [0, 0, 1, 1], [], []>} : vector<8x8xbf16>, vector<8x512xbf16>, vector<8x512xf32> -> vector<8x512xf32>
    %159 = arith.addf %154, %158 : vector<8x512xf32>
    %c0_103 = arith.constant 0 : index
    %c128_104 = arith.constant 128 : index
    %160 = vector.load %arg7[%c0_103, %c128_104] : memref<8x768xbf16, #tpu.memory_space<vmem>>, vector<8x512xbf16>
    %c4_105 = arith.constant 4 : index
    %c0_106 = arith.constant 0 : index
    %c0_107 = arith.constant 0 : index
    %161 = vector.load %arg3[%c4_105, %c0_106, %c0_107] : memref<9x8x8xbf16, #tpu.memory_space<vmem>>, vector<1x8x8xbf16>
    %162 = vector.shape_cast %161 : vector<1x8x8xbf16> to vector<8x8xbf16>
    %cst_108 = arith.constant dense<0.000000e+00> : vector<8x512xf32>
    %163 = tpu.matmul %162, %160, %cst_108 {dimension_numbers = #tpu.dot_dimension_numbers<[1], [0], [0], [1], [0, 0, 1, 1], [], []>} : vector<8x8xbf16>, vector<8x512xbf16>, vector<8x512xf32> -> vector<8x512xf32>
    %164 = arith.addf %159, %163 : vector<8x512xf32>
    %c0_109 = arith.constant 0 : index
    %c129_110 = arith.constant 129 : index
    %165 = vector.load %arg7[%c0_109, %c129_110] : memref<8x768xbf16, #tpu.memory_space<vmem>>, vector<8x512xbf16>
    %c5_111 = arith.constant 5 : index
    %c0_112 = arith.constant 0 : index
    %c0_113 = arith.constant 0 : index
    %166 = vector.load %arg3[%c5_111, %c0_112, %c0_113] : memref<9x8x8xbf16, #tpu.memory_space<vmem>>, vector<1x8x8xbf16>
    %167 = vector.shape_cast %166 : vector<1x8x8xbf16> to vector<8x8xbf16>
    %cst_114 = arith.constant dense<0.000000e+00> : vector<8x512xf32>
    %168 = tpu.matmul %167, %165, %cst_114 {dimension_numbers = #tpu.dot_dimension_numbers<[1], [0], [0], [1], [0, 0, 1, 1], [], []>} : vector<8x8xbf16>, vector<8x512xbf16>, vector<8x512xf32> -> vector<8x512xf32>
    %169 = arith.addf %164, %168 : vector<8x512xf32>
    %c0_115 = arith.constant 0 : index
    %c145_116 = arith.constant 145 : index
    %170 = vector.load %arg7[%c0_115, %c145_116] : memref<8x768xbf16, #tpu.memory_space<vmem>>, vector<8x512xbf16>
    %c6_117 = arith.constant 6 : index
    %c0_118 = arith.constant 0 : index
    %c0_119 = arith.constant 0 : index
    %171 = vector.load %arg3[%c6_117, %c0_118, %c0_119] : memref<9x8x8xbf16, #tpu.memory_space<vmem>>, vector<1x8x8xbf16>
    %172 = vector.shape_cast %171 : vector<1x8x8xbf16> to vector<8x8xbf16>
    %cst_120 = arith.constant dense<0.000000e+00> : vector<8x512xf32>
    %173 = tpu.matmul %172, %170, %cst_120 {dimension_numbers = #tpu.dot_dimension_numbers<[1], [0], [0], [1], [0, 0, 1, 1], [], []>} : vector<8x8xbf16>, vector<8x512xbf16>, vector<8x512xf32> -> vector<8x512xf32>
    %174 = arith.addf %169, %173 : vector<8x512xf32>
    %c0_121 = arith.constant 0 : index
    %c146_122 = arith.constant 146 : index
    %175 = vector.load %arg7[%c0_121, %c146_122] : memref<8x768xbf16, #tpu.memory_space<vmem>>, vector<8x512xbf16>
    %c7_123 = arith.constant 7 : index
    %c0_124 = arith.constant 0 : index
    %c0_125 = arith.constant 0 : index
    %176 = vector.load %arg3[%c7_123, %c0_124, %c0_125] : memref<9x8x8xbf16, #tpu.memory_space<vmem>>, vector<1x8x8xbf16>
    %177 = vector.shape_cast %176 : vector<1x8x8xbf16> to vector<8x8xbf16>
    %cst_126 = arith.constant dense<0.000000e+00> : vector<8x512xf32>
    %178 = tpu.matmul %177, %175, %cst_126 {dimension_numbers = #tpu.dot_dimension_numbers<[1], [0], [0], [1], [0, 0, 1, 1], [], []>} : vector<8x8xbf16>, vector<8x512xbf16>, vector<8x512xf32> -> vector<8x512xf32>
    %179 = arith.addf %174, %178 : vector<8x512xf32>
    %c0_127 = arith.constant 0 : index
    %c147_128 = arith.constant 147 : index
    %180 = vector.load %arg7[%c0_127, %c147_128] : memref<8x768xbf16, #tpu.memory_space<vmem>>, vector<8x512xbf16>
    %c8_129 = arith.constant 8 : index
    %c0_130 = arith.constant 0 : index
    %c0_131 = arith.constant 0 : index
    %181 = vector.load %arg3[%c8_129, %c0_130, %c0_131] : memref<9x8x8xbf16, #tpu.memory_space<vmem>>, vector<1x8x8xbf16>
    %182 = vector.shape_cast %181 : vector<1x8x8xbf16> to vector<8x8xbf16>
    %cst_132 = arith.constant dense<0.000000e+00> : vector<8x512xf32>
    %183 = tpu.matmul %182, %180, %cst_132 {dimension_numbers = #tpu.dot_dimension_numbers<[1], [0], [0], [1], [0, 0, 1, 1], [], []>} : vector<8x8xbf16>, vector<8x512xbf16>, vector<8x512xf32> -> vector<8x512xf32>
    %184 = arith.addf %179, %183 : vector<8x512xf32>
    %c0_133 = arith.constant 0 : index
    %c3_134 = arith.constant 3 : index
    %185 = vector.load %arg4[%c0_133, %c3_134] : memref<8x6xf32, #tpu.memory_space<vmem>>, vector<8x1xf32>
    %c0_135 = arith.constant 0 : index
    %c4_136 = arith.constant 4 : index
    %186 = vector.load %arg4[%c0_135, %c4_136] : memref<8x6xf32, #tpu.memory_space<vmem>>, vector<8x1xf32>
    %c0_137 = arith.constant 0 : index
    %c5_138 = arith.constant 5 : index
    %187 = vector.load %arg4[%c0_137, %c5_138] : memref<8x6xf32, #tpu.memory_space<vmem>>, vector<8x1xf32>
    %188 = vector.broadcast %185 : vector<8x1xf32> to vector<8x512xf32>
    %189 = arith.addf %184, %188 : vector<8x512xf32>
    %190 = vector.broadcast %0 : vector<1x512xf32> to vector<8x512xf32>
    %191 = arith.mulf %189, %190 : vector<8x512xf32>
    %cst_139 = arith.constant dense<0.000000e+00> : vector<8xf32>
    %192 = vector.multi_reduction <add>, %191, %cst_139 [1] : vector<8x512xf32> to vector<8xf32>
    %193 = vector.shape_cast %192 : vector<8xf32> to vector<8x1xf32>
    %194 = arith.mulf %191, %191 : vector<8x512xf32>
    %cst_140 = arith.constant dense<0.000000e+00> : vector<8xf32>
    %195 = vector.multi_reduction <add>, %194, %cst_140 [1] : vector<8x512xf32> to vector<8xf32>
    %196 = vector.shape_cast %195 : vector<8xf32> to vector<8x1xf32>
    %197 = tpu.iota {dimensions = array<i32: 0>} : vector<8x1xi32>
    %cst_141 = arith.constant 0.000000e+00 : f32
    %198 = vector.broadcast %cst_141 : f32 to vector<8x1xf32>
    %cst_142 = arith.constant 0.000000e+00 : f32
    %199 = vector.broadcast %cst_142 : f32 to vector<8x1xf32>
    %c0_i32_143 = arith.constant 0 : i32
    %200 = vector.broadcast %c0_i32_143 : i32 to vector<8x1xi32>
    %201 = arith.cmpi sge, %197, %200 : vector<8x1xi32>
    %c2_i32_144 = arith.constant 2 : i32
    %202 = vector.broadcast %c2_i32_144 : i32 to vector<8x1xi32>
    %203 = arith.cmpi slt, %197, %202 : vector<8x1xi32>
    %204 = arith.andi %201, %203 : vector<8x1xi1>
    %cst_145 = arith.constant 0.000000e+00 : f32
    %205 = vector.broadcast %cst_145 : f32 to vector<8x1xf32>
    %206 = arith.select %204, %193, %205 : vector<8x1xi1>, vector<8x1xf32>
    %207 = vector.shape_cast %206 : vector<8x1xf32> to vector<1x8x1xf32>
    %cst_146 = arith.constant dense<0.000000e+00> : vector<1xf32>
    %208 = vector.multi_reduction <add>, %207, %cst_146 [1, 2] : vector<1x8x1xf32> to vector<1xf32>
    %209 = vector.shape_cast %208 : vector<1xf32> to vector<1x1x1xf32>
    %210 = vector.extract %209[0, 0, 0] : f32 from vector<1x1x1xf32>
    %cst_147 = arith.constant 0.000000e+00 : f32
    %211 = vector.broadcast %cst_147 : f32 to vector<8x1xf32>
    %212 = arith.select %204, %196, %211 : vector<8x1xi1>, vector<8x1xf32>
    %213 = vector.shape_cast %212 : vector<8x1xf32> to vector<1x8x1xf32>
    %cst_148 = arith.constant dense<0.000000e+00> : vector<1xf32>
    %214 = vector.multi_reduction <add>, %213, %cst_148 [1, 2] : vector<1x8x1xf32> to vector<1xf32>
    %215 = vector.shape_cast %214 : vector<1xf32> to vector<1x1x1xf32>
    %216 = vector.extract %215[0, 0, 0] : f32 from vector<1x1x1xf32>
    %cst_149 = arith.constant 5.120000e+02 : f32
    %217 = arith.divf %210, %cst_149 : f32
    %cst_150 = arith.constant 5.120000e+02 : f32
    %218 = arith.divf %216, %cst_150 : f32
    %219 = arith.mulf %217, %217 : f32
    %220 = arith.subf %218, %219 : f32
    %cst_151 = arith.constant 9.99999974E-6 : f32
    %221 = arith.addf %220, %cst_151 : f32
    %222 = math.rsqrt %221 : f32
    %223 = vector.broadcast %217 : f32 to vector<8x1xf32>
    %224 = arith.select %204, %223, %198 : vector<8x1xi1>, vector<8x1xf32>
    %225 = vector.broadcast %222 : f32 to vector<8x1xf32>
    %226 = arith.select %204, %225, %199 : vector<8x1xi1>, vector<8x1xf32>
    %c2_i32_152 = arith.constant 2 : i32
    %227 = vector.broadcast %c2_i32_152 : i32 to vector<8x1xi32>
    %228 = arith.cmpi sge, %197, %227 : vector<8x1xi32>
    %c4_i32_153 = arith.constant 4 : i32
    %229 = vector.broadcast %c4_i32_153 : i32 to vector<8x1xi32>
    %230 = arith.cmpi slt, %197, %229 : vector<8x1xi32>
    %231 = arith.andi %228, %230 : vector<8x1xi1>
    %cst_154 = arith.constant 0.000000e+00 : f32
    %232 = vector.broadcast %cst_154 : f32 to vector<8x1xf32>
    %233 = arith.select %231, %193, %232 : vector<8x1xi1>, vector<8x1xf32>
    %234 = vector.shape_cast %233 : vector<8x1xf32> to vector<1x8x1xf32>
    %cst_155 = arith.constant dense<0.000000e+00> : vector<1xf32>
    %235 = vector.multi_reduction <add>, %234, %cst_155 [1, 2] : vector<1x8x1xf32> to vector<1xf32>
    %236 = vector.shape_cast %235 : vector<1xf32> to vector<1x1x1xf32>
    %237 = vector.extract %236[0, 0, 0] : f32 from vector<1x1x1xf32>
    %cst_156 = arith.constant 0.000000e+00 : f32
    %238 = vector.broadcast %cst_156 : f32 to vector<8x1xf32>
    %239 = arith.select %231, %196, %238 : vector<8x1xi1>, vector<8x1xf32>
    %240 = vector.shape_cast %239 : vector<8x1xf32> to vector<1x8x1xf32>
    %cst_157 = arith.constant dense<0.000000e+00> : vector<1xf32>
    %241 = vector.multi_reduction <add>, %240, %cst_157 [1, 2] : vector<1x8x1xf32> to vector<1xf32>
    %242 = vector.shape_cast %241 : vector<1xf32> to vector<1x1x1xf32>
    %243 = vector.extract %242[0, 0, 0] : f32 from vector<1x1x1xf32>
    %cst_158 = arith.constant 5.120000e+02 : f32
    %244 = arith.divf %237, %cst_158 : f32
    %cst_159 = arith.constant 5.120000e+02 : f32
    %245 = arith.divf %243, %cst_159 : f32
    %246 = arith.mulf %244, %244 : f32
    %247 = arith.subf %245, %246 : f32
    %cst_160 = arith.constant 9.99999974E-6 : f32
    %248 = arith.addf %247, %cst_160 : f32
    %249 = math.rsqrt %248 : f32
    %250 = vector.broadcast %244 : f32 to vector<8x1xf32>
    %251 = arith.select %231, %250, %224 : vector<8x1xi1>, vector<8x1xf32>
    %252 = vector.broadcast %249 : f32 to vector<8x1xf32>
    %253 = arith.select %231, %252, %226 : vector<8x1xi1>, vector<8x1xf32>
    %254 = arith.mulf %253, %186 : vector<8x1xf32>
    %255 = arith.mulf %251, %254 : vector<8x1xf32>
    %256 = arith.subf %187, %255 : vector<8x1xf32>
    %257 = vector.broadcast %254 : vector<8x1xf32> to vector<8x512xf32>
    %258 = arith.mulf %189, %257 : vector<8x512xf32>
    %259 = vector.broadcast %256 : vector<8x1xf32> to vector<8x512xf32>
    %260 = arith.addf %258, %259 : vector<8x512xf32>
    %cst_161 = arith.constant 2.000000e-01 : f32
    %261 = vector.broadcast %cst_161 : f32 to vector<8x512xf32>
    %262 = arith.mulf %261, %260 : vector<8x512xf32>
    %263 = arith.maximumf %260, %262 : vector<8x512xf32>
    %264 = vector.broadcast %0 : vector<1x512xf32> to vector<8x512xf32>
    %265 = arith.mulf %263, %264 : vector<8x512xf32>
    %c0_162 = arith.constant 0 : index
    %c0_163 = arith.constant 0 : index
    %c0_164 = arith.constant 0 : index
    %266 = vector.load %arg6[%c0_162, %c0_163, %c0_164] : memref<1x8x512xf32, #tpu.memory_space<vmem>>, vector<1x8x512xf32>
    %267 = vector.shape_cast %266 : vector<1x8x512xf32> to vector<8x512xf32>
    %268 = vector.shape_cast %265 : vector<8x512xf32> to vector<1x8x512xf32>
    tpu.vector_store %arg6[%c0_162, %c0_163, %c0_164], %268 {strides = array<i32>} : memref<1x8x512xf32, #tpu.memory_space<vmem>>, vector<1x8x512xf32>,
    return
  }
  func.func @transform_0(%arg0: i32) -> (i32, i32, i32) {
    %c0_i32 = arith.constant 0 : i32
    %c0_i32_0 = arith.constant 0 : i32
    %c0_i32_1 = arith.constant 0 : i32
    return %arg0, %c0_i32, %c0_i32_0 : i32, i32, i32
  }
  func.func @transform_1(%arg0: i32) -> (i32, i32, i32) {
    %c0_i32 = arith.constant 0 : i32
    %c0_i32_0 = arith.constant 0 : i32
    %c0_i32_1 = arith.constant 0 : i32
    %c0_i32_2 = arith.constant 0 : i32
    return %c0_i32, %c0_i32_0, %c0_i32_1 : i32, i32, i32
  }
  func.func @transform_2(%arg0: i32) -> (i32, i32, i32) {
    %c0_i32 = arith.constant 0 : i32
    %c0_i32_0 = arith.constant 0 : i32
    %c0_i32_1 = arith.constant 0 : i32
    %c0_i32_2 = arith.constant 0 : i32
    return %c0_i32, %c0_i32_0, %c0_i32_1 : i32, i32, i32
  }
  func.func @transform_3(%arg0: i32) -> (i32, i32) {
    %c0_i32 = arith.constant 0 : i32
    %c0_i32_0 = arith.constant 0 : i32
    %c0_i32_1 = arith.constant 0 : i32
    return %c0_i32, %c0_i32_0 : i32, i32
  }
  func.func @transform_4(%arg0: i32) -> (i32, i32) {
    %c0_i32 = arith.constant 0 : i32
    %c0_i32_0 = arith.constant 0 : i32
    %c0_i32_1 = arith.constant 0 : i32
    return %c0_i32, %c0_i32_0 : i32, i32
  }
  func.func @transform_5(%arg0: i32) -> (i32, i32, i32) {
    %c0_i32 = arith.constant 0 : i32
    %c0_i32_0 = arith.constant 0 : i32
    %c0_i32_1 = arith.constant 0 : i32
    return %arg0, %c0_i32, %c0_i32_0 : i32, i32, i32
  }
}

</mosaic_0001>

<bundles_post_ra>
// kernel: tpu_custom_call.1
= control target key start
LH: loop header
LB: loop body
LE: loop exit
PB: predicated region body
PF: predicated region fallthrough
CT: control target
= control target key end

     0   :  { %10 = vsyncpa [#allocation4], 0  ;;  %s3800_s0 = inlined_call_operand.vmem [shape: bf16[2,8,768], index: 0, kind: input, shape index: {}]   ;;  %s3801_s1 = inlined_call_operand.vmem [shape: bf16[9,8,8], index: 1, kind: input, shape index: {}]   ;;  %s3802_s2 = inlined_call_operand.vmem [shape: bf16[9,8,8], index: 2, kind: input, shape index: {}]   ;;  %s3803_s3 = inlined_call_operand.vmem [shape: f32[8,6], index: 3, kind: input, shape index: {}]   ;;  %s3804_s4 = inlined_call_operand.vmem [shape: f32[1,512], index: 4, kind: input, shape index: {}]   ;;  %s3805_s5 = inlined_call_operand.hbm [shape: f32[2,8,512], index: 5, kind: output, shape index: {}]  }
   0x1   :  { %12 = vsyncpa [#allocation4 + $0x1], 0  ;;  %s3148_s18 = smov 0   ;;  %s3150_s19 = smov 0  }
   0x2   :  { %s3152_s20 = smov 0   ;;  %s3154_s21 = smov 0  }
   0x3 LB: > { %s3169_s22 = sadd.s32 4294967295, %s3101_s21   ;;  %s2793_s23 = sadd.s32 4294967294, %s3101_s21   ;;  %s3101_s21 = sphi %s3154_s21, %s3816_s21   ;;  %s3097_s20 = sphi %s3152_s20, %s3815_s20   ;;  %s3093_s19 = sphi %s3150_s19, %s3814_s19   ;;  %s3089_s18 = sphi %s3148_s18, %s3813_s18  }
   0x4   : > { %s3173_s24 = sadd.s32 1, %s3101_s21   ;;  %s135_s25 = sadd.s32 1, %s3097_s20 }
   0x5   : > { %s132_s26 = ssub.s32 %s3101_s21, %s3173_s24  ;;  %p145_p0 = scmp.ne.s32.totalorder %s3097_s20, %s3093_s19 }
   0x6   : > { %p133_p1 = scmp.eq.s32.totalorder %s132_s26, 0  ;;  %p146_p2 = scmp.eq.s32.totalorder %s3169_s22, 1 }
   0x7   : > { %p151_p3 = scmp.ne.s32.totalorder %s3093_s19, %s3089_s18  ;;  %p152_p4 = scmp.eq.s32.totalorder %s2793_s23, 1 }
   0x8   : > { %s3184_s27 = scalar_select %p133_p1, %s3097_s20, %s135_s25  }
   0x9   : > { %p3186_p5 = por %p146_p2, %p145_p0  ;;  %p3190_p6 = por %p152_p4, %p151_p3 }
   0xa   : > { %p2796_p7 = scmp.ge.s32.totalorder %s3101_s21, 1  ;;  %p190_p8 = scmp.lt.s32.totalorder %s3101_s21, 3 }
   0xc   : > { %p191_p9 = pnand %p2796_p7, %p190_p8 }
   0xd   : > { %p218_p10 = scmp.lt.s32.totalorder (!%p191_p9), %s3169_s22, 1  ;;  %v3103_v0 = vmov (!%p191_p9), 0   ;;  %s3104_s10 = smov (!%p191_p9), 18   ;;  %v3281_v15 = vld [vmem:[%s3803_s3] sm:$0xff] (!%p191_p9)  ;;  %vm254_vm0 = vcmask (!%p191_p9), 146432   ;;  %vm263_vm1 = vcmask (!%p191_p9), 1043456  }
   0xe   : > { %194 = sbr.rel (%p191_p9) target bundleno = 2403 (0x963), region = 40  ;;  %308 = vmatprep.mubr.bf16.mxu0 (!%p191_p9), %v3103_v0  ;;  %1480 = vst [vmem:[#allocation2] sm:$0xf] (!%p191_p9), %v3103_v0  ;;  %1481 = vst [vmem:[#allocation2 + $0x14] sm:$0xf] (!%p191_p9), %v3103_v0  ;;  %349 = vmatprep.mubr.bf16.mxu1 (!%p191_p9), %v3103_v0  ;;  %s3105_s11 = smov (!%p191_p9), 19  }
   0xf   : > { %3003 = vset.pattern.permute.xlu0 (!%p191_p9), %v3103_v0  ;;  %s3106_s12 = smov (!%p191_p9), 17   ;;  %s3107_s13 = smov (!%p191_p9), 1   ;;  %v2799_v23 = vld [vmem:[%s3801_s1 + $0x4] sm:$0xf] (!%p191_p9)  ;;  %vm259_vm2 = vcmask (!%p191_p9), 64512   ;;  %vm368_vm3 = vcmask (!%p191_p9), 154624  }
  0x10   : > { %s3108_s14 = smov (!%p191_p9), 127   ;;  %s3109_s15 = smov (!%p191_p9), 111   ;;  %v228_v34 = vld [vmem:[%s3801_s1] sm:$0xf] (!%p191_p9)  ;;  %vm482_vm4 = vcmask (!%p191_p9), 138240   ;;  %vm600_vm5 = vcmask (!%p191_p9), 7168  }
  0x11   : > { %s3110_s16 = smov (!%p191_p9), 110   ;;  %s3806_s17 = smov (!%p191_p9), 109   ;;  %v2813_v48 = vld [vmem:[%s3801_s1 + $0x8] sm:$0xf] (!%p191_p9)  ;;  %v2818_v58 = vld [vmem:[%s3801_s1 + $0xc] sm:$0xf] (!%p191_p9) }
  0x12   : > { %vm849_vm6 = vcmask (!%p191_p9), 1039360   ;;  %vm967_vm7 = vcmask (!%p191_p9), 908288   ;;  %vm1085_vm8 = vcmask (!%p191_p9), 900096   ;;  %vm1203_vm9 = vcmask (!%p191_p9), 891904  }
  0x15   : > { %s219_s30 = scalar_select %p218_p10, %s3169_s22, 1 }
  0x17   : > { %s2925_s6 = smul.u32 24, %s219_s30 }
  0x19   : > { %s3205_s9 = scalar_lea.vmem %s3800_s0, %s2925_s6 }
  0x1a   : > { %v226_v1 = vld [vmem:[%s3205_s9 + $0x8] sm:$0xff]  ;;  %v225_v2 = vld [vmem:[%s3205_s9] sm:$0xff]  ;;  %v3014_v7 = vld [vmem:[%s3205_s9 + $0x10] ss:$0 sps:$4 sm:$0xff]  }
  0x1b   : > { %v2802_v3 = vcombine.low %v226_v1, %v226_v1  ;;  %v2800_v4 = vcombine.low %v225_v2, %v225_v2  ;;  %v2803_v5 = vcombine.high %v226_v1, %v226_v1  ;;  %v2801_v6 = vcombine.high %v225_v2, %v225_v2  ;;  %v821_v8 = vld [vmem:[%s3205_s9 + $0x4] sm:$0xff]  ;;  %v822_v11 = vld [vmem:[%s3205_s9 + $0xc] sm:$0xff]  ;;  %v3019_v14 = vld [vmem:[%s3205_s9 + $0x14] ss:$0 sps:$4 sm:$0xff]  }
  0x1c   : > { %v3232_v9 = vcombine.high %v821_v8, %v821_v8  ;;  %v3234_v10 = vcombine.low %v821_v8, %v821_v8  ;;  %v3241_v12 = vcombine.high %v822_v11, %v822_v11  ;;  %v3243_v13 = vcombine.low %v822_v11, %v822_v11 }
  0x1d   : > { %248 = vrot.lane.b32.xlu1 %v2802_v3, %s3104_s10  ;;  %244 = vrot.lane.b32.xlu0 %v2800_v4, %s3104_s10 }
  0x1e   : > { %v724_v61 = vsel %vm263_vm1, %v3234_v10, 0 }
  0x21   : > { %250 = vrot.lane.b32.xlu1 %v2803_v5, %s3104_s10  ;;  %246 = vrot.lane.b32.xlu0 %v2801_v6, %s3104_s10 }
  0x25   : > { %358 = vrot.lane.b32.xlu1 %v2800_v4, %s3105_s11  ;;  %252 = vrot.lane.b32.xlu0 %v3014_v7, %s3104_s10 }
  0x29   : > { %362 = vrot.lane.b32.xlu1 %v2802_v3, %s3105_s11  ;;  %360 = vrot.lane.b32.xlu0 %v2801_v6, %s3105_s11 }
  0x2d   : > { %366 = vrot.lane.b32.xlu1 %v3014_v7, %s3105_s11  ;;  %364 = vrot.lane.b32.xlu0 %v2803_v5, %s3105_s11 }
  0x31   : > { %474 = vrot.lane.b32.xlu1 %v2801_v6, %s3106_s12  ;;  %472 = vrot.lane.b32.xlu0 %v2800_v4, %s3106_s12 }
  0x35   : > { %478 = vrot.lane.b32.xlu1 %v2803_v5, %s3106_s12  ;;  %476 = vrot.lane.b32.xlu0 %v2802_v3, %s3106_s12 }
  0x39   : > { %590 = vrot.lane.b32.xlu1 %v2800_v4, %s3107_s13  ;;  %480 = vrot.lane.b32.xlu0 %v3014_v7, %s3106_s12  ;;  %v730_v4 = vsel %vm263_vm1, %v3243_v13, 0 }
  0x3d   : > { %594 = vrot.lane.b32.xlu1 %v2802_v3, %s3107_s13  ;;  %592 = vrot.lane.b32.xlu0 %v2801_v6, %s3107_s13  ;;  %v2823_v6 = vld [vmem:[%s3801_s1 + $0x10] sm:$0xf] }
  0x41   : > { %598 = vrot.lane.b32.xlu1 %v3014_v7, %s3107_s13  ;;  %596 = vrot.lane.b32.xlu0 %v2803_v5, %s3107_s13 }
  0x45   : > { %841 = vrot.lane.b32.xlu1 %v3232_v9, %s3108_s14  ;;  %839 = vrot.lane.b32.xlu0 %v3234_v10, %s3108_s14 }
  0x49   : > { %845 = vrot.lane.b32.xlu1 %v3241_v12, %s3108_s14  ;;  %843 = vrot.lane.b32.xlu0 %v3243_v13, %s3108_s14 }
  0x4d   : > { %957 = vrot.lane.b32.xlu1 %v3234_v10, %s3109_s15  ;;  %847 = vrot.lane.b32.xlu0 %v3019_v14, %s3108_s14 }
  0x51   : > { %961 = vrot.lane.b32.xlu1 %v3243_v13, %s3109_s15  ;;  %959 = vrot.lane.b32.xlu0 %v3232_v9, %s3109_s15 }
  0x55   : > { %965 = vrot.lane.b32.xlu1 %v3019_v14, %s3109_s15  ;;  %963 = vrot.lane.b32.xlu0 %v3241_v12, %s3109_s15 }
  0x59   : > { %1077 = vrot.lane.b32.xlu1 %v3232_v9, %s3110_s16  ;;  %1075 = vrot.lane.b32.xlu0 %v3234_v10, %s3110_s16 }
  0x5d   : > { %1081 = vrot.lane.b32.xlu1 %v3241_v12, %s3110_s16  ;;  %1079 = vrot.lane.b32.xlu0 %v3243_v13, %s3110_s16 }
  0x61   : > { %1193 = vrot.lane.b32.xlu1 %v3234_v10, %s3806_s17  ;;  %1083 = vrot.lane.b32.xlu0 %v3019_v14, %s3110_s16 }
  0x65   : > { %1197 = vrot.lane.b32.xlu1 %v3243_v13, %s3806_s17  ;;  %1195 = vrot.lane.b32.xlu0 %v3232_v9, %s3806_s17 }
  0x69   : > { %1201 = vrot.lane.b32.xlu1 %v3019_v14, %s3806_s17  ;;  %1199 = vrot.lane.b32.xlu0 %v3241_v12, %s3806_s17 }
  0x6d   : > { %1312 = vperm.xlu0 %3003, %v3281_v15  }
  0x8f   : > { %v249_v16 = vpop.permute.xlu1 %248  ;;  %v245_v17 = vpop.permute.xlu0 %244 }
  0x93   : > { %v251_v18 = vpop.permute.xlu1 %250  ;;  %v247_v19 = vpop.permute.xlu0 %246 }
  0x94   : > { %v256_v20 = vsel %vm254_vm0, %v247_v19, %v249_v16  ;;  %v255_v21 = vsel %vm254_vm0, %v245_v17, %v247_v19  ;;  %v257_v24 = vsel %vm254_vm0, %v249_v16, %v251_v18  ;;  %v2832_v17 = vld [vmem:[%s3801_s1 + $0x14] sm:$0xf] }
  0x95   : > { %2805 = vmatprep.subr.msk.bf16.mxu0 %vm263_vm1, %v256_v20  ;;  %v265_v22 = vsel %vm263_vm1, %v255_v21, 0  ;;  %v271_v28 = vsel %vm263_vm1, %v257_v24, 0 }
  0x96   : > { %277 = vmatpush1.bf16.msra.mxu0 %v265_v22 }
  0x97   : > { %v359_v25 = vpop.permute.xlu1 %358  ;;  %v253_v26 = vpop.permute.xlu0 %252 }
  0x98   : > { %v258_v27 = vsel %vm254_vm0, %v251_v18, %v253_v26 }
  0x99   : > { %2806 = vmatmul.mubr.msk.bf16.vlgmr.msra.gmra.mrb[0].mxu0 %vm259_vm2, %v2799_v23  ;;  %2807 = vmatprep.subr.msk.bf16.mxu1 %vm263_vm1, %v258_v27 }
  0x9a   : > { %318 = vmatpush1.bf16.msra.mxu1 %v271_v28  ;;  %420 = vmatprep.mubr.bf16.mxu0 %v3103_v0  ;;  %v2842_v28 = vld [vmem:[%s3801_s1 + $0x18] sm:$0xf] }
  0x9b   : > { %v363_v29 = vpop.permute.xlu1 %362  ;;  %v361_v30 = vpop.permute.xlu0 %360 }
  0x9c   : > { %v369_v31 = vsel %vm368_vm3, %v359_v25, %v361_v30  ;;  %v370_v32 = vsel %vm368_vm3, %v361_v30, %v363_v29 }
  0x9d   : > { %v377_v33 = vsel %vm263_vm1, %v369_v31, 0  ;;  %2808 = vmatmul.mubr.msk.bf16.vlgmr.msra.gmra.mrb[0].mxu1 %vm259_vm2, %v2799_v23  ;;  %2809 = vmatprep.subr.msk.bf16.mxu0 %vm263_vm1, %v370_v32 }
  0x9e   : > { %389 = vmatpush1.bf16.msra.mxu0 %v377_v33  ;;  %461 = vmatprep.mubr.bf16.mxu1 %v3103_v0 }
  0x9f   : > { %v367_v35 = vpop.permute.xlu1 %366  ;;  %v365_v36 = vpop.permute.xlu0 %364 }
  0xa0   : > { %v371_v37 = vsel %vm368_vm3, %v363_v29, %v365_v36  ;;  %v372_v38 = vsel %vm368_vm3, %v365_v36, %v367_v35 }
  0xa1   : > { %v383_v39 = vsel %vm263_vm1, %v371_v37, 0  ;;  %2810 = vmatmul.mubr.msk.bf16.vlgmr.msra.gmra.mrb[4].mxu0 %vm259_vm2, %v228_v34  ;;  %2811 = vmatprep.subr.msk.bf16.mxu1 %vm263_vm1, %v372_v38  ;;  %v2847_v37 = vld [vmem:[%s3801_s1 + $0x1c] sm:$0xf] }
  0xa2   : > { %430 = vmatpush1.bf16.msra.mxu1 %v383_v39  ;;  %534 = vmatprep.mubr.bf16.mxu0 %v3103_v0 }
  0xa3   : > { %v475_v40 = vpop.permute.xlu1 %474  ;;  %v473_v41 = vpop.permute.xlu0 %472 }
  0xa4   : > { %v483_v42 = vsel %vm482_vm4, %v473_v41, %v475_v40 }
  0xa5   : > { %2812 = vmatmul.mubr.msk.bf16.vlgmr.msra.gmra.mrb[4].mxu1 %vm259_vm2, %v228_v34  ;;  %v491_v46 = vsel %vm263_vm1, %v483_v42, 0 }
  0xa6   : > { %575 = vmatprep.mubr.bf16.mxu1 %v3103_v0 }
  0xa7   : > { %v479_v43 = vpop.permute.xlu1 %478  ;;  %v477_v44 = vpop.permute.xlu0 %476 }
  0xa8   : > { %v484_v45 = vsel %vm482_vm4, %v475_v40, %v477_v44  ;;  %v485_v47 = vsel %vm482_vm4, %v477_v44, %v479_v43 }
  0xa9   : > { %2814 = vmatprep.subr.msk.bf16.mxu0 %vm263_vm1, %v484_v45  ;;  %v497_v52 = vsel %vm263_vm1, %v485_v47, 0  ;;  %v2852_v47 = vld [vmem:[%s3801_s1 + $0x20] sm:$0xf] }
  0xaa   : > { %503 = vmatpush1.bf16.msra.mxu0 %v491_v46 }
  0xab   : > { %v591_v49 = vpop.permute.xlu1 %590  ;;  %v481_v50 = vpop.permute.xlu0 %480 }
  0xac   : > { %v486_v51 = vsel %vm482_vm4, %v479_v43, %v481_v50 }
  0xad   : > { %2815 = vmatmul.mubr.msk.bf16.vlgmr.msra.gmra.mrb[8].mxu0 %vm259_vm2, %v2813_v48  ;;  %2816 = vmatprep.subr.msk.bf16.mxu1 %vm263_vm1, %v486_v51 }
  0xae   : > { %544 = vmatpush1.bf16.msra.mxu1 %v497_v52  ;;  %652 = vmatprep.mubr.bf16.mxu0 %v3103_v0 }
  0xaf   : > { %v595_v53 = vpop.permute.xlu1 %594  ;;  %v593_v54 = vpop.permute.xlu0 %592 }
  0xb0   : > { %v601_v55 = vsel %vm600_vm5, %v591_v49, %v593_v54  ;;  %v602_v56 = vsel %vm600_vm5, %v593_v54, %v595_v53 }
  0xb1   : > { %v609_v57 = vsel %vm263_vm1, %v601_v55, 0  ;;  %2817 = vmatmul.mubr.msk.bf16.vlgmr.msra.gmra.mrb[8].mxu1 %vm259_vm2, %v2813_v48  ;;  %2819 = vmatprep.subr.msk.bf16.mxu0 %vm263_vm1, %v602_v56 }
  0xb2   : > { %621 = vmatpush1.bf16.msra.mxu0 %v609_v57  ;;  %693 = vmatprep.mubr.bf16.mxu1 %v3103_v0 }
  0xb3   : > { %v599_v59 = vpop.permute.xlu1 %598  ;;  %v597_v60 = vpop.permute.xlu0 %596  ;;  %2828 = vmatprep.subr.msk.bf16.mxu0 %vm263_vm1, %v3232_v9 }
  0xb4   : > { %v603_v62 = vsel %vm600_vm5, %v595_v53, %v597_v60  ;;  %v604_v63 = vsel %vm600_vm5, %v597_v60, %v599_v59 }
  0xb5   : > { %v615_v1 = vsel %vm263_vm1, %v603_v62, 0  ;;  %2820 = vmatmul.mubr.msk.bf16.vlgmr.msra.gmra.mrb[12].mxu0 %vm259_vm2, %v2818_v58  ;;  %2821 = vmatprep.subr.msk.bf16.mxu1 %vm263_vm1, %v604_v63 }
  0xb6   : > { %662 = vmatpush1.bf16.msra.mxu1 %v615_v1  ;;  %736 = vmatpush1.bf16.msra.mxu0 %v724_v61 }
  0xb7   : > { %v842_v2 = vpop.permute.xlu1 %841  ;;  %v840_v3 = vpop.permute.xlu0 %839  ;;  %767 = vmatprep.mubr.bf16.mxu0 %v3103_v0  ;;  %2830 = vmatprep.subr.msk.bf16.mxu1 %vm263_vm1, %v3241_v12 }
  0xb8   : > { %v850_v5 = vsel %vm849_vm6, %v840_v3, %v842_v2 }
  0xb9   : > { %2822 = vmatmul.mubr.msk.bf16.vlgmr.msra.gmra.mrb[12].mxu1 %vm259_vm2, %v2818_v58  ;;  %v858_v10 = vsel %vm263_vm1, %v850_v5, 0 }
  0xba   : > { %777 = vmatpush1.bf16.msra.mxu1 %v730_v4  ;;  %808 = vmatprep.mubr.bf16.mxu1 %v3103_v0 }
  0xbb   : > { %v846_v7 = vpop.permute.xlu1 %845  ;;  %v844_v8 = vpop.permute.xlu0 %843 }
  0xbc   : > { %v851_v9 = vsel %vm849_vm6, %v842_v2, %v844_v8  ;;  %v852_v11 = vsel %vm849_vm6, %v844_v8, %v846_v7 }
  0xbd   : > { %2829 = vmatmul.mubr.msk.bf16.vlgmr.msra.gmra.mrb[16].mxu0 %vm259_vm2, %v2823_v6  ;;  %2838 = vmatprep.subr.msk.bf16.mxu0 %vm263_vm1, %v851_v9  ;;  %v864_v16 = vsel %vm263_vm1, %v852_v11, 0 }
  0xbe   : > { %870 = vmatpush1.bf16.msra.mxu0 %v858_v10  ;;  %901 = vmatprep.mubr.bf16.mxu0 %v3103_v0 }
  0xbf   : > { %v958_v12 = vpop.permute.xlu1 %957  ;;  %v848_v13 = vpop.permute.xlu0 %847 }
  0xc0   : > { %v853_v14 = vsel %vm849_vm6, %v846_v7, %v848_v13 }
  0xc1   : > { %2831 = vmatmul.mubr.msk.bf16.vlgmr.msra.gmra.mrb[16].mxu1 %vm259_vm2, %v2823_v6  ;;  %2840 = vmatprep.subr.msk.bf16.mxu1 %vm263_vm1, %v853_v14 }
  0xc2   : > { %911 = vmatpush1.bf16.msra.mxu1 %v864_v16  ;;  %942 = vmatprep.mubr.bf16.mxu1 %v3103_v0 }
  0xc3   : > { %v962_v18 = vpop.permute.xlu1 %961  ;;  %v960_v19 = vpop.permute.xlu0 %959 }
  0xc4   : > { %v968_v20 = vsel %vm967_vm7, %v958_v12, %v960_v19  ;;  %v969_v21 = vsel %vm967_vm7, %v960_v19, %v962_v18 }
  0xc5   : > { %v976_v22 = vsel %vm263_vm1, %v968_v20, 0  ;;  %2839 = vmatmul.mubr.msk.bf16.vlgmr.msra.gmra.mrb[20].mxu0 %vm259_vm2, %v2832_v17  ;;  %2843 = vmatprep.subr.msk.bf16.mxu0 %vm263_vm1, %v969_v21 }
  0xc6   : > { %988 = vmatpush1.bf16.msra.mxu0 %v976_v22  ;;  %1019 = vmatprep.mubr.bf16.mxu0 %v3103_v0 }
  0xc7   : > { %v966_v23 = vpop.permute.xlu1 %965  ;;  %v964_v24 = vpop.permute.xlu0 %963 }
  0xc8   : > { %v970_v25 = vsel %vm967_vm7, %v962_v18, %v964_v24  ;;  %v971_v26 = vsel %vm967_vm7, %v964_v24, %v966_v23 }
  0xc9   : > { %v982_v27 = vsel %vm263_vm1, %v970_v25, 0  ;;  %2841 = vmatmul.mubr.msk.bf16.vlgmr.msra.gmra.mrb[20].mxu1 %vm259_vm2, %v2832_v17  ;;  %2845 = vmatprep.subr.msk.bf16.mxu1 %vm263_vm1, %v971_v26 }
  0xca   : > { %1029 = vmatpush1.bf16.msra.mxu1 %v982_v27  ;;  %1060 = vmatprep.mubr.bf16.mxu1 %v3103_v0 }
  0xcb   : > { %v1078_v29 = vpop.permute.xlu1 %1077  ;;  %v1076_v30 = vpop.permute.xlu0 %1075 }
  0xcc   : > { %v1086_v31 = vsel %vm1085_vm8, %v1076_v30, %v1078_v29 }
  0xcd   : > { %2844 = vmatmul.mubr.msk.bf16.vlgmr.msra.gmra.mrb[24].mxu0 %vm259_vm2, %v2842_v28  ;;  %v1094_v35 = vsel %vm263_vm1, %v1086_v31, 0 }
  0xce   : > { %1137 = vmatprep.mubr.bf16.mxu0 %v3103_v0 }
  0xcf   : > { %v1082_v32 = vpop.permute.xlu1 %1081  ;;  %v1080_v33 = vpop.permute.xlu0 %1079 }
  0xd0   : > { %v1087_v34 = vsel %vm1085_vm8, %v1078_v29, %v1080_v33  ;;  %v1088_v36 = vsel %vm1085_vm8, %v1080_v33, %v1082_v32 }
  0xd1   : > { %2846 = vmatmul.mubr.msk.bf16.vlgmr.msra.gmra.mrb[24].mxu1 %vm259_vm2, %v2842_v28  ;;  %2848 = vmatprep.subr.msk.bf16.mxu0 %vm263_vm1, %v1087_v34  ;;  %v1100_v41 = vsel %vm263_vm1, %v1088_v36, 0 }
  0xd2   : > { %1106 = vmatpush1.bf16.msra.mxu0 %v1094_v35  ;;  %1178 = vmatprep.mubr.bf16.mxu1 %v3103_v0 }
  0xd3   : > { %v1194_v38 = vpop.permute.xlu1 %1193  ;;  %v1084_v39 = vpop.permute.xlu0 %1083 }
  0xd4   : > { %v1089_v40 = vsel %vm1085_vm8, %v1082_v32, %v1084_v39 }
  0xd5   : > { %2849 = vmatmul.mubr.msk.bf16.vlgmr.msra.gmra.mrb[28].mxu0 %vm259_vm2, %v2847_v37  ;;  %2850 = vmatprep.subr.msk.bf16.mxu1 %vm263_vm1, %v1089_v40 }
  0xd6   : > { %1147 = vmatpush1.bf16.msra.mxu1 %v1100_v41  ;;  %1255 = vmatprep.mubr.bf16.mxu0 %v3103_v0 }
  0xd7   : > { %v1198_v42 = vpop.permute.xlu1 %1197  ;;  %v1196_v43 = vpop.permute.xlu0 %1195 }
  0xd8   : > { %v1204_v44 = vsel %vm1203_vm9, %v1194_v38, %v1196_v43  ;;  %v1205_v45 = vsel %vm1203_vm9, %v1196_v43, %v1198_v42 }
  0xd9   : > { %v1212_v46 = vsel %vm263_vm1, %v1204_v44, 0  ;;  %2851 = vmatmul.mubr.msk.bf16.vlgmr.msra.gmra.mrb[28].mxu1 %vm259_vm2, %v2847_v37  ;;  %2853 = vmatprep.subr.msk.bf16.mxu0 %vm263_vm1, %v1205_v45 }
  0xda   : > { %1224 = vmatpush1.bf16.msra.mxu0 %v1212_v46  ;;  %1296 = vmatprep.mubr.bf16.mxu1 %v3103_v0 }
  0xdb   : > { %v1202_v48 = vpop.permute.xlu1 %1201  ;;  %v1200_v49 = vpop.permute.xlu0 %1199 }
  0xdc   : > { %v1206_v50 = vsel %vm1203_vm9, %v1198_v42, %v1200_v49  ;;  %v1207_v51 = vsel %vm1203_vm9, %v1200_v49, %v1202_v48 }
  0xdd   : > { %v1218_v52 = vsel %vm263_vm1, %v1206_v50, 0  ;;  %2854 = vmatmul.mubr.msk.bf16.vlgmr.msra.gmra.mrb[32].mxu0 %vm259_vm2, %v2852_v47  ;;  %2855 = vmatprep.subr.msk.bf16.mxu1 %vm263_vm1, %v1207_v51 }
  0xde   : > { %1265 = vmatpush1.bf16.msra.mxu1 %v1218_v52  ;;  %1580 = vmatprep.mubr.bf16.mxu0 %v3103_v0 }
  0xe1   : > { %2856 = vmatmul.mubr.msk.bf16.vlgmr.msra.gmra.mrb[32].mxu1 %vm259_vm2, %v2852_v47 }
  0xe2   : > { %1621 = vmatprep.mubr.bf16.mxu1 %v3103_v0 }
 0x16c   : > { %v310_v53 = vpop.f32.mrb[0].mxu0 }
 0x16d   : > { %v312_v54 = vpop.f32.mrb[1].mxu0 }
 0x16e   : > { %v314_v55 = vpop.f32.mrb[2].mxu0 }
 0x16f   : > { %v315_v56 = vpop.f32.mrb[3].mxu0 }
 0x170   : > { %v351_v57 = vpop.f32.mrb[0].mxu1 }
 0x171   : > { %v353_v58 = vpop.f32.mrb[1].mxu1 }
 0x172   : > { %v355_v59 = vpop.f32.mrb[2].mxu1 }
 0x173   : > { %v356_v60 = vpop.f32.mrb[3].mxu1 }
 0x174   : > { %v422_v61 = vpop.f32.mrb[4].mxu0 }
 0x175   : > { %v423_v62 = vadd.f32 %v422_v61, %v310_v53  ;;  %v424_v63 = vpop.f32.mrb[5].mxu0 }
 0x176   : > { %v425_v1 = vadd.f32 %v424_v63, %v312_v54  ;;  %v426_v2 = vpop.f32.mrb[6].mxu0 }
 0x177   : > { %v427_v3 = vpop.f32.mrb[7].mxu0 }
 0x178   : > { %v463_v4 = vpop.f32.mrb[4].mxu1 }
 0x179   : > { %v464_v5 = vadd.f32 %v463_v4, %v351_v57  ;;  %v465_v6 = vpop.f32.mrb[5].mxu1 }
 0x17a   : > { %v466_v7 = vadd.f32 %v465_v6, %v353_v58  ;;  %v467_v8 = vpop.f32.mrb[6].mxu1 }
 0x17b   : > { %v468_v9 = vpop.f32.mrb[7].mxu1 }
 0x180   : > { %v536_v10 = vpop.f32.mrb[8].mxu0 }
 0x181   : > { %v584_v11 = vadd.f32 %v536_v10, %v423_v62  ;;  %v538_v12 = vpop.f32.mrb[9].mxu0 }
 0x182   : > { %v585_v13 = vadd.f32 %v538_v12, %v425_v1  ;;  %v540_v14 = vpop.f32.mrb[10].mxu0 }
 0x183   : > { %v541_v16 = vpop.f32.mrb[11].mxu0 }
 0x184   : > { %v577_v17 = vpop.f32.mrb[8].mxu1 }
 0x185   : > { %v586_v18 = vadd.f32 %v577_v17, %v464_v5  ;;  %v579_v19 = vpop.f32.mrb[9].mxu1  ;;  %v1320_v5 = vlaneseq }
 0x186   : > { %v587_v20 = vadd.f32 %v579_v19, %v466_v7  ;;  %v581_v21 = vpop.f32.mrb[10].mxu1 }
 0x187   : > { %v582_v22 = vpop.f32.mrb[11].mxu1  ;;  %v3419_v12 = vshrl.u32 %v1320_v5, 7 }
 0x188   : > { %v654_v23 = vpop.f32.mrb[12].mxu0 }
 0x189   : > { %v702_v24 = vadd.f32 %v654_v23, %v584_v11  ;;  %v656_v25 = vpop.f32.mrb[13].mxu0  ;;  %v224_v23 = vld [vmem:[%s3804_s4] sm:$0xf]  ;;  %vm1402_vm10 = vcmp.ge.s32.totalorder %v3419_v12, 2  ;;  %vm1403_vm11 = vcmp.lt.s32.totalorder %v3419_v12, 4  ;;  %vm1361_vm12 = vcmp.lt.s32.totalorder %v3419_v12, 2 }
 0x18a   : > { %v703_v26 = vadd.f32 %v656_v25, %v585_v13  ;;  %v658_v27 = vpop.f32.mrb[14].mxu0  ;;  %vm3455_vm13 = vmand %vm1402_vm10, %vm1403_vm11 }
 0x18b   : > { %v659_v28 = vpop.f32.mrb[15].mxu0  ;;  %v1313_v27 = vpop.permute.xlu0 %1312 }
 0x18c   : > { %v695_v29 = vpop.f32.mrb[12].mxu1 }
 0x18d   : > { %v704_v30 = vadd.f32 %v695_v29, %v586_v18  ;;  %v697_v31 = vpop.f32.mrb[13].mxu1 }
 0x18e   : > { %v705_v32 = vadd.f32 %v697_v31, %v587_v20  ;;  %v699_v33 = vpop.f32.mrb[14].mxu1  ;;  %v1322_v20 = vsub.s32 0, %v3419_v12 }
 0x18f   : > { %v700_v34 = vpop.f32.mrb[15].mxu1 }
 0x190   : > { %v769_v35 = vpop.f32.mrb[16].mxu0  ;;  %v3427_v31 = vrot.slane %v224_v23, %v1322_v20 }
 0x191   : > { %v817_v36 = vadd.f32 %v769_v35, %v702_v24  ;;  %v771_v37 = vpop.f32.mrb[17].mxu0  ;;  %v1326_v24 = vsub.s32 1, %v3419_v12  ;;  %v1334_v35 = vsub.s32 3, %v3419_v12 }
 0x192   : > { %v818_v38 = vadd.f32 %v771_v37, %v703_v26  ;;  %v773_v39 = vpop.f32.mrb[18].mxu0 }
 0x193   : > { %v774_v40 = vpop.f32.mrb[19].mxu0  ;;  %v3429_v34 = vrot.slane %v224_v23, %v1326_v24 }
 0x194   : > { %v810_v41 = vpop.f32.mrb[16].mxu1 }
 0x195   : > { %v819_v42 = vadd.f32 %v810_v41, %v704_v30  ;;  %v812_v43 = vpop.f32.mrb[17].mxu1  ;;  %v1330_v30 = vsub.s32 2, %v3419_v12 }
 0x196   : > { %v820_v44 = vadd.f32 %v812_v43, %v705_v32  ;;  %v814_v45 = vpop.f32.mrb[18].mxu1 }
 0x197   : > { %v815_v46 = vpop.f32.mrb[19].mxu1  ;;  %v3436_v41 = vrot.slane %v224_v23, %v1330_v30 }
 0x198   : > { %v903_v47 = vpop.f32.mrb[20].mxu0  ;;  %v3440_v46 = vrot.slane %v224_v23, %v1334_v35 }
 0x199   : > { %v951_v48 = vadd.f32 %v903_v47, %v817_v36  ;;  %v905_v49 = vpop.f32.mrb[21].mxu0 }
 0x19a   : > { %v952_v50 = vadd.f32 %v905_v49, %v818_v38  ;;  %v907_v51 = vpop.f32.mrb[22].mxu0 }
 0x19b   : > { %v908_v52 = vpop.f32.mrb[23].mxu0 }
 0x19c   : > { %v944_v53 = vpop.f32.mrb[20].mxu1 }
 0x19d   : > { %v953_v54 = vadd.f32 %v944_v53, %v819_v42  ;;  %v946_v55 = vpop.f32.mrb[21].mxu1 }
 0x19e   : > { %v954_v56 = vadd.f32 %v946_v55, %v820_v44  ;;  %v948_v57 = vpop.f32.mrb[22].mxu1 }
 0x19f   : > { %v949_v58 = vpop.f32.mrb[23].mxu1 }
 0x1a0   : > { %v1021_v59 = vpop.f32.mrb[24].mxu0 }
 0x1a1   : > { %v1069_v60 = vadd.f32 %v1021_v59, %v951_v48  ;;  %v1023_v61 = vpop.f32.mrb[25].mxu0 }
 0x1a2   : > { %v1070_v62 = vadd.f32 %v1023_v61, %v952_v50  ;;  %v1025_v63 = vpop.f32.mrb[26].mxu0 }
 0x1a3   : > { %v1026_v1 = vpop.f32.mrb[27].mxu0 }
 0x1a4   : > { %v1062_v2 = vpop.f32.mrb[24].mxu1 }
 0x1a5   : > { %v1071_v3 = vadd.f32 %v1062_v2, %v953_v54  ;;  %v1064_v4 = vpop.f32.mrb[25].mxu1 }
 0x1a6   : > { %v1072_v6 = vadd.f32 %v1064_v4, %v954_v56  ;;  %v1066_v7 = vpop.f32.mrb[26].mxu1 }
 0x1a7   : > { %v1067_v8 = vpop.f32.mrb[27].mxu1 }
 0x1a8   : > { %v1139_v9 = vpop.f32.mrb[28].mxu0 }
 0x1a9   : > { %v1187_v10 = vadd.f32 %v1139_v9, %v1069_v60  ;;  %v1141_v11 = vpop.f32.mrb[29].mxu0 }
 0x1aa   : > { %v1188_v13 = vadd.f32 %v1141_v11, %v1070_v62  ;;  %v1143_v14 = vpop.f32.mrb[30].mxu0 }
 0x1ab   : > { %v1144_v16 = vpop.f32.mrb[31].mxu0 }
 0x1ac   : > { %v1180_v17 = vpop.f32.mrb[28].mxu1 }
 0x1ad   : > { %v1189_v18 = vadd.f32 %v1180_v17, %v1071_v3  ;;  %v1182_v19 = vpop.f32.mrb[29].mxu1 }
 0x1ae   : > { %v1190_v21 = vadd.f32 %v1182_v19, %v1072_v6  ;;  %v1184_v22 = vpop.f32.mrb[30].mxu1 }
 0x1af   : > { %v1185_v25 = vpop.f32.mrb[31].mxu1 }
 0x1b0   : > { %v1257_v26 = vpop.f32.mrb[32].mxu0 }
 0x1b1   : > { %v1305_v28 = vadd.f32 %v1257_v26, %v1187_v10  ;;  %v1259_v29 = vpop.f32.mrb[33].mxu0 }
 0x1b2   : > { %v1306_v32 = vadd.f32 %v1259_v29, %v1188_v13  ;;  %v1261_v33 = vpop.f32.mrb[34].mxu0 }
 0x1b3   : > { %v3432_v36 = vadd.f32 %v1313_v27, %v1305_v28  ;;  %v1262_v37 = vpop.f32.mrb[35].mxu0 }
 0x1b4   : > { %v3434_v38 = vadd.f32 %v1313_v27, %v1306_v32  ;;  %v1298_v39 = vpop.f32.mrb[32].mxu1 }
 0x1b5   : > { %v1307_v40 = vadd.f32 %v1298_v39, %v1189_v18  ;;  %v1300_v42 = vpop.f32.mrb[33].mxu1  ;;  %v1340_v43 = vmul.f32 %v3427_v31, %v3432_v36 }
 0x1b6   : > { %v1308_v44 = vadd.f32 %v1300_v42, %v1190_v21  ;;  %v1302_v45 = vpop.f32.mrb[34].mxu1  ;;  %v1341_v47 = vmul.f32 %v3429_v34, %v3434_v38 }
 0x1b7   : > { %v3444_v48 = vadd.f32 %v1313_v27, %v1307_v40  ;;  %v1303_v49 = vpop.f32.mrb[35].mxu1  ;;  %v1349_v50 = vmul.f32 %v1340_v43, %v1340_v43  ;;  %v3112_v45 = vmov 1  }
 0x1b8   : > { %v3446_v51 = vadd.f32 %v1313_v27, %v1308_v44  ;;  %v1344_v52 = vadd.f32 %v1341_v47, %v1340_v43  ;;  %v1350_v53 = vmul.f32 %v1341_v47, %v1341_v47  ;;  %3004 = vset.pattern.permute.xlu0 %v3112_v45 }
 0x1b9   : > { %v1342_v54 = vmul.f32 %v3436_v41, %v3444_v48 }
 0x1ba   : > { %v1343_v55 = vmul.f32 %v3440_v46, %v3446_v51  ;;  %v1353_v56 = vadd.f32 %v1350_v53, %v1349_v50 }
 0x1bb   : > { %v1345_v57 = vadd.f32 %v1344_v52, %v1342_v54  ;;  %v1351_v58 = vmul.f32 %v1342_v54, %v1342_v54 }
 0x1bc   : > { %v1352_v59 = vmul.f32 %v1343_v55, %v1343_v55 }
 0x1bd   : > { %v1346_v60 = vadd.f32 %v1345_v57, %v1343_v55  ;;  %v1354_v61 = vadd.f32 %v1353_v56, %v1351_v58  ;;  %v3113_v58 = vmov 2  }
 0x1be   : > { %3005 = vset.pattern.permute.xlu1 %v3113_v58 }
 0x1bf   : > { %1347 = vadd.xlane.f32.xlu1 %v1346_v60  ;;  %v1355_v62 = vadd.f32 %v1354_v61, %v1352_v59 }
 0x1c1   : > { %1356 = vadd.xlane.f32.xlu0 %v1355_v62 }
 0x24c   : > { %v1348_v63 = vpop.xlane.xlu1 %1347 }
 0x24d   : > { %v1363_v2 = vsel %vm1361_vm12, %v1348_v63, 0.0  ;;  %v1405_v6 = vsel %vm3455_vm13, %v1348_v63, 0.0 }
 0x24e   : > { %v1357_v3 = vpop.xlane.xlu0 %1356  ;;  %v1365_v4 = vsel %vm600_vm5, %v1363_v2, 0.0  ;;  %v1406_v9 = vsel %vm600_vm5, %v1405_v6, 0.0 }
 0x24f   : > { %1366 = vadd.xlane.f32.xlu1 %v1365_v4  ;;  %v1375_v5 = vsel %vm1361_vm12, %v1357_v3, 0.0  ;;  %v1416_v8 = vsel %vm3455_vm13, %v1357_v3, 0.0 }
 0x250   : > { %v1376_v7 = vsel %vm600_vm5, %v1375_v5, 0.0  ;;  %v1417_v10 = vsel %vm600_vm5, %v1416_v8, 0.0 }
 0x251   : > { %1377 = vadd.xlane.f32.xlu0 %v1376_v7 }
 0x253   : > { %1407 = vadd.xlane.f32.xlu1 %v1406_v9 }
 0x255   : > { %1418 = vadd.xlane.f32.xlu0 %v1417_v10 }
 0x2dc   : > { %v1367_v11 = vpop.xlane.xlu1 %1366 }
 0x2dd   : > { %v1368_v13 = vrot.slane %v1367_v11, 4 }
 0x2de   : > { %v1378_v14 = vpop.xlane.xlu0 %1377 }
 0x2df   : > { %v1369_v16 = vadd.f32 %v1368_v13, %v1367_v11  ;;  %v1379_v17 = vrot.slane %v1378_v14, 4 }
 0x2e0   : > { %v1408_v27 = vpop.xlane.xlu1 %1407 }
 0x2e1   : > { %v1370_v18 = vrot.slane %v1369_v16, 2  ;;  %v1380_v19 = vadd.f32 %v1379_v17, %v1378_v14  ;;  %v1409_v29 = vrot.slane %v1408_v27, 4 }
 0x2e2   : > { %v1419_v28 = vpop.xlane.xlu0 %1418 }
 0x2e3   : > { %v1381_v20 = vrot.slane %v1380_v19, 2  ;;  %v1371_v21 = vadd.f32 %v1370_v18, %v1369_v16  ;;  %v1420_v30 = vrot.slane %v1419_v28, 4  ;;  %v1410_v32 = vadd.f32 %v1409_v29, %v1408_v27 }
 0x2e5   : > { %v1372_v22 = vrot.slane %v1371_v21, 1  ;;  %v1382_v23 = vadd.f32 %v1381_v20, %v1380_v19  ;;  %v1421_v33 = vadd.f32 %v1420_v30, %v1419_v28  ;;  %v1411_v35 = vrot.slane %v1410_v32, 2 }
 0x2e7   : > { %v1373_v24 = vadd.f32 %v1372_v22, %v1371_v21  ;;  %v1383_v25 = vrot.slane %v1382_v23, 1  ;;  %v1422_v37 = vrot.slane %v1421_v33, 2  ;;  %v1412_v40 = vadd.f32 %v1411_v35, %v1410_v32 }
 0x2e9   : > { %2926 = vpush %v1373_v24  ;;  %v1384_v26 = vadd.f32 %v1383_v25, %v1382_v23  ;;  %v1423_v42 = vadd.f32 %v1422_v37, %v1421_v33  ;;  %v1413_v43 = vrot.slane %v1412_v40, 1  ;;  %v3025_v37 = vld [vmem:[#allocation2 + $0x14] ss:$0 sps:$4 sm:$0xff]  }
 0x2eb   : > { %2928 = vpush %v1384_v26  ;;  %v1424_v44 = vrot.slane %v1423_v42, 1  ;;  %v1414_v49 = vadd.f32 %v1413_v43, %v1412_v40 }
 0x2ed   : > { %v1425_v50 = vadd.f32 %v1424_v44, %v1423_v42  ;;  %v3114_v44 = vmov 3  }
 0x31a   : > { %s2927_s8 = spop %2926 }
 0x31b   : > { %s3471_s9 = smul.f32 0.001953125, %s2927_s8 }
 0x31c   : > { %s2929_s23 = spop %2928 }
 0x31d   : > { %s1392_s25 = smul.f32 %s3471_s9, %s3471_s9  ;;  %v1398_v52 = vstv %s3471_s9 }
 0x31e   : > { %s1391_s26 = smul.f32 0.001953125, %s2929_s23  ;;  %v1399_v53 = vsel %vm1361_vm12, %v1398_v52, 0.0 }
 0x320   : > { %s1393_s30 = ssub.f32 %s1391_s26, %s1392_s25 }
 0x322   : > { %s1394_s6 = sadd.f32 1e-05, %s1393_s30 }
 0x324   : > { %v1395_v39 = vstv %s1394_s6 }
 0x325   : > { %3026 = vrsqrt.f32 %v1395_v39 }
 0x32f   : > { %v3027_v47 = vpop.eup %3026 }
 0x330   : > { %2930 = vpush %v3027_v47 }
 0x331   : > { %2932 = vpush %v1414_v49 }
 0x332   : > { %2934 = vpush %v1425_v50 }
 0x361   : > { %s2931_s7 = spop %2930 }
 0x362   : > { %s2933_s8 = spop %2932  ;;  %v1400_v59 = vstv %s2931_s7 }
 0x363   : > { %s1429_s23 = smul.f32 0.001953125, %s2933_s8  ;;  %s2935_s25 = spop %2934  ;;  %v1401_v60 = vsel %vm1361_vm12, %v1400_v59, 0.0 }
 0x364   : > { %s1432_s26 = smul.f32 0.001953125, %s2935_s25 }
 0x365   : > { %s1433_s30 = smul.f32 %s1429_s23, %s1429_s23  ;;  %v1439_v54 = vstv %s1429_s23 }
 0x366   : > { %v1440_v55 = vsel %vm3455_vm13, %v1439_v54, %v1399_v53 }
 0x367   : > { %s1434_s6 = ssub.f32 %s1432_s26, %s1433_s30 }
 0x369   : > { %s1435_s17 = sadd.f32 1e-05, %s1434_s6 }
 0x36b   : > { %v1436_v56 = vstv %s1435_s17 }
 0x36c   : > { %3028 = vrsqrt.f32 %v1436_v56 }
 0x376   : > { %v3029_v57 = vpop.eup %3028 }
 0x377   : > { %2936 = vpush %v3029_v57  ;;  %v2859_v57 = vld [vmem:[%s3802_s2 + $0x4] sm:$0xf] }
 0x3a8   : > { %s2937_s9 = spop %2936 }
 0x3a9   : > { %v1441_v61 = vstv %s2937_s9 }
 0x3aa   : > { %v1442_v62 = vsel %vm3455_vm13, %v1441_v61, %v1401_v60 }
 0x3ab   : > { %v1443_v63 = vmul.f32 %v1442_v62, %v3281_v15 }
 0x3ad   : > { %1452 = vperm.xlu0 %3004, %v1443_v63   ;;  %v1444_v2 = vmul.f32 %v1443_v63, %v1440_v55 }
 0x3af   : > { %1446 = vrot.lane.b32.xlu1 %v1444_v2, %s3107_s13 }
 0x421   : > { %v1447_v3 = vpop.permute.xlu1 %1446 }
 0x422   : > { %v1449_v4 = vsub.f32 %v3281_v15, %v1447_v3 }
 0x424   : > { %1461 = vperm.xlu1 %3005, %v1449_v4  }
 0x428   : > { %3006 = vset.pattern.permute.xlu1 %v3114_v44 }
 0x42c   : > { %v1453_v5 = vpop.permute.xlu0 %1452 }
 0x42d   : > { %v1455_v6 = vmul.f32 %v1453_v5, %v3432_v36  ;;  %v1456_v7 = vmul.f32 %v1453_v5, %v3434_v38  ;;  %v1457_v8 = vmul.f32 %v1453_v5, %v3444_v48  ;;  %v1458_v9 = vmul.f32 %v1453_v5, %v3446_v51 }
 0x4a3   : > { %v1462_v10 = vpop.permute.xlu1 %1461 }
 0x4a4   : > { %v1464_v11 = vadd.f32 %v1462_v10, %v1455_v6  ;;  %v1465_v13 = vadd.f32 %v1462_v10, %v1456_v7  ;;  %v1466_v14 = vadd.f32 %v1462_v10, %v1457_v8  ;;  %v1467_v16 = vadd.f32 %v1462_v10, %v1458_v9  ;;  %v1503_v8 = vld [vmem:[%s3802_s2] sm:$0xf] }
 0x4a6   : > { %v1468_v17 = vmul.f32 0.2, %v1464_v11  ;;  %v1469_v18 = vmul.f32 0.2, %v1465_v13  ;;  %v1470_v19 = vmul.f32 0.2, %v1466_v14 }
 0x4a7   : > { %v1471_v20 = vmul.f32 0.2, %v1467_v16 }
 0x4a8   : > { %v1472_v21 = vmax.f32 %v1464_v11, %v1468_v17  ;;  %v1473_v22 = vmax.f32 %v1465_v13, %v1469_v18  ;;  %v1474_v23 = vmax.f32 %v1466_v14, %v1470_v19 }
 0x4a9   : > { %v1475_v24 = vmax.f32 %v1467_v16, %v1471_v20 }
 0x4aa   : > { %v1476_v36 = vmul.f32 %v1472_v21, %v3427_v31  ;;  %v1477_v38 = vmul.f32 %v1473_v22, %v3429_v34  ;;  %v1478_v48 = vmul.f32 %v1474_v23, %v3436_v41  ;;  %v2873_v23 = vld [vmem:[%s3802_s2 + $0x8] sm:$0xf] }
 0x4ab   : > { %v1479_v51 = vmul.f32 %v1475_v24, %v3440_v46 }
 0x4ac   : > { %v2922_v25 = vpack.c.bf16 %v1477_v38, %v1476_v36  ;;  %v3511_v39 = vpack.c.bf16 %v1477_v38, %v1477_v38  ;;  %v3521_v42 = vpack.c.bf16 %v1476_v36, %v1476_v36  ;;  %v3526_v43 = vpack.c.bf16 %v1478_v48, %v1478_v48 }
 0x4ad   : > { %v2923_v26 = vpack.c.bf16 %v1479_v51, %v1478_v48  ;;  %v3516_v40 = vpack.c.bf16 %v1479_v51, %v1479_v51 }
 0x4ae   : > { %1498 = vst [vmem:[#allocation2 + $0x4] sm:$0xff] %v2922_v25 }
 0x4af   : > { %1499 = vst [vmem:[#allocation2 + $0xc] sm:$0xff] %v2923_v26 }
 0x4b5   : > { %v1500_v27 = vld [vmem:[#allocation2] sm:$0xff] }
 0x4b6   : > { %v1501_v28 = vld [vmem:[#allocation2 + $0x8] sm:$0xff]  ;;  %v2860_v29 = vcombine.low %v1500_v27, %v1500_v27  ;;  %v2861_v32 = vcombine.high %v1500_v27, %v1500_v27  ;;  %v3022_v33 = vld [vmem:[#allocation2 + $0x10] ss:$0 sps:$4 sm:$0xff]  }
 0x4b7   : > { %v2862_v30 = vcombine.low %v1501_v28, %v1501_v28  ;;  %v2863_v35 = vcombine.high %v1501_v28, %v1501_v28 }
 0x4b8   : > { %1519 = vrot.lane.b32.xlu1 %v2860_v29, %s3104_s10 }
 0x4b9   : > { %1634 = vrot.lane.b32.xlu0 %v2862_v30, %s3105_s11 }
 0x4bc   : > { %1521 = vrot.lane.b32.xlu1 %v2861_v32, %s3104_s10 }
 0x4bd   : > { %1638 = vrot.lane.b32.xlu0 %v3022_v33, %s3105_s11 }
 0x4c0   : > { %1523 = vrot.lane.b32.xlu1 %v2862_v30, %s3104_s10 }
 0x4c1   : > { %1745 = vrot.lane.b32.xlu0 %v2861_v32, %s3106_s12 }
 0x4c4   : > { %1525 = vrot.lane.b32.xlu1 %v2863_v35, %s3104_s10 }
 0x4c5   : > { %1749 = vrot.lane.b32.xlu0 %v2863_v35, %s3106_s12 }
 0x4c8   : > { %1527 = vrot.lane.b32.xlu1 %v3022_v33, %s3104_s10  ;;  %s3812_s10 = smov 109  }
 0x4c9   : > { %1860 = vrot.lane.b32.xlu0 %v2860_v29, %s3107_s13 }
 0x4cc   : > { %1630 = vrot.lane.b32.xlu1 %v2860_v29, %s3105_s11 }
 0x4cd   : > { %1864 = vrot.lane.b32.xlu0 %v2862_v30, %s3107_s13 }
 0x4d0   : > { %1632 = vrot.lane.b32.xlu1 %v2861_v32, %s3105_s11 }
 0x4d1   : > { %1868 = vrot.lane.b32.xlu0 %v3022_v33, %s3107_s13 }
 0x4d4   : > { %1636 = vrot.lane.b32.xlu1 %v2863_v35, %s3105_s11 }
 0x4d5   : > { %2233 = vrot.lane.b32.xlu0 %v3025_v37, %s3109_s15 }
 0x4d8   : > { %1743 = vrot.lane.b32.xlu1 %v2860_v29, %s3106_s12  ;;  %v2878_v29 = vld [vmem:[%s3802_s2 + $0xc] sm:$0xf] }
 0x4d9   : > { %2110 = vrot.lane.b32.xlu0 %v3511_v39, %s3108_s14 }
 0x4dc   : > { %1747 = vrot.lane.b32.xlu1 %v2862_v30, %s3106_s12 }
 0x4dd   : > { %2114 = vrot.lane.b32.xlu0 %v3516_v40, %s3108_s14 }
 0x4e0   : > { %1751 = vrot.lane.b32.xlu1 %v3022_v33, %s3106_s12 }
 0x4e1   : > { %2225 = vrot.lane.b32.xlu0 %v3521_v42, %s3109_s15 }
 0x4e4   : > { %1862 = vrot.lane.b32.xlu1 %v2861_v32, %s3107_s13 }
 0x4e5   : > { %2229 = vrot.lane.b32.xlu0 %v3526_v43, %s3109_s15 }
 0x4e8   : > { %1866 = vrot.lane.b32.xlu1 %v2863_v35, %s3107_s13 }
 0x4e9   : > { %2344 = vrot.lane.b32.xlu0 %v3511_v39, %s3110_s16 }
 0x4ec   : > { %2116 = vrot.lane.b32.xlu1 %v3025_v37, %s3108_s14 }
 0x4ed   : > { %2348 = vrot.lane.b32.xlu0 %v3516_v40, %s3110_s16 }
 0x4f0   : > { %2108 = vrot.lane.b32.xlu1 %v3521_v42, %s3108_s14 }
 0x4f1   : > { %2459 = vrot.lane.b32.xlu0 %v3521_v42, %s3812_s10 }
 0x4f4   : > { %2112 = vrot.lane.b32.xlu1 %v3526_v43, %s3108_s14 }
 0x4f5   : > { %2463 = vrot.lane.b32.xlu0 %v3526_v43, %s3812_s10 }
 0x4f8   : > { %2227 = vrot.lane.b32.xlu1 %v3511_v39, %s3109_s15 }
 0x4f9   : > { %2467 = vrot.lane.b32.xlu0 %v3025_v37, %s3812_s10 }
 0x4fc   : > { %2231 = vrot.lane.b32.xlu1 %v3516_v40, %s3109_s15 }
 0x500   : > { %2342 = vrot.lane.b32.xlu1 %v3521_v42, %s3110_s16 }
 0x504   : > { %2346 = vrot.lane.b32.xlu1 %v3526_v43, %s3110_s16 }
 0x508   : > { %2350 = vrot.lane.b32.xlu1 %v3025_v37, %s3110_s16  ;;  %v1993_v37 = vsel %vm263_vm1, %v3521_v42, 0  ;;  %v2883_v42 = vld [vmem:[%s3802_s2 + $0x10] sm:$0xf] }
 0x50c   : > { %2461 = vrot.lane.b32.xlu1 %v3511_v39, %s3812_s10 }
 0x510   : > { %2465 = vrot.lane.b32.xlu1 %v3516_v40, %s3812_s10 }
 0x514   : > { %2577 = vperm.xlu1 %3006, %v3281_v15  }
 0x52a   : > { %v1520_v45 = vpop.permute.xlu1 %1519 }
 0x52b   : > { %v1635_v47 = vpop.permute.xlu0 %1634 }
 0x52e   : > { %v1522_v49 = vpop.permute.xlu1 %1521 }
 0x52f   : > { %v1639_v50 = vpop.permute.xlu0 %1638  ;;  %v1529_v52 = vsel %vm254_vm0, %v1520_v45, %v1522_v49  ;;  %v1999_v45 = vsel %vm263_vm1, %v3526_v43, 0 }
 0x530   : > { %v1537_v56 = vsel %vm263_vm1, %v1529_v52, 0 }
 0x532   : > { %v1524_v53 = vpop.permute.xlu1 %1523 }
 0x533   : > { %v1746_v54 = vpop.permute.xlu0 %1745  ;;  %v1530_v55 = vsel %vm254_vm0, %v1522_v49, %v1524_v53 }
 0x534   : > { %2865 = vmatprep.subr.msk.bf16.mxu0 %vm263_vm1, %v1530_v55 }
 0x535   : > { %1549 = vmatpush1.bf16.msra.mxu0 %v1537_v56  ;;  %v2892_v56 = vld [vmem:[%s3802_s2 + $0x14] sm:$0xf] }
 0x536   : > { %v1526_v15 = vpop.permute.xlu1 %1525 }
 0x537   : > { %v1750_v58 = vpop.permute.xlu0 %1749  ;;  %v1531_v59 = vsel %vm254_vm0, %v1524_v53, %v1526_v15 }
 0x538   : > { %2866 = vmatmul.mubr.msk.bf16.vlgmr.msra.gmra.mrb[36].mxu0 %vm259_vm2, %v2859_v57  ;;  %v1543_v63 = vsel %vm263_vm1, %v1531_v59, 0 }
 0x539   : > { %1691 = vmatprep.mubr.bf16.mxu0 %v3103_v0 }
 0x53a   : > { %v1528_v60 = vpop.permute.xlu1 %1527 }
 0x53b   : > { %v1861_v61 = vpop.permute.xlu0 %1860  ;;  %v1532_v62 = vsel %vm254_vm0, %v1526_v15, %v1528_v60 }
 0x53c   : > { %2867 = vmatprep.subr.msk.bf16.mxu1 %vm263_vm1, %v1532_v62 }
 0x53d   : > { %1590 = vmatpush1.bf16.msra.mxu1 %v1543_v63 }
 0x53e   : > { %v1631_v2 = vpop.permute.xlu1 %1630 }
 0x53f   : > { %v1865_v3 = vpop.permute.xlu0 %1864 }
 0x540   : > { %2868 = vmatmul.mubr.msk.bf16.vlgmr.msra.gmra.mrb[36].mxu1 %vm259_vm2, %v2859_v57 }
 0x541   : > { %1732 = vmatprep.mubr.bf16.mxu1 %v3103_v0 }
 0x542   : > { %v1633_v4 = vpop.permute.xlu1 %1632 }
 0x543   : > { %v1640_v5 = vsel %vm368_vm3, %v1631_v2, %v1633_v4  ;;  %v1641_v6 = vsel %vm368_vm3, %v1633_v4, %v1635_v47  ;;  %v1869_v9 = vpop.permute.xlu0 %1868  ;;  %v2902_v4 = vld [vmem:[%s3802_s2 + $0x18] sm:$0xf] }
 0x544   : > { %v1648_v7 = vsel %vm263_vm1, %v1640_v5, 0  ;;  %2869 = vmatprep.subr.msk.bf16.mxu0 %vm263_vm1, %v1641_v6 }
 0x545   : > { %1660 = vmatpush1.bf16.msra.mxu0 %v1648_v7 }
 0x546   : > { %v1637_v10 = vpop.permute.xlu1 %1636 }
 0x547   : > { %v1642_v11 = vsel %vm368_vm3, %v1635_v47, %v1637_v10  ;;  %v1643_v13 = vsel %vm368_vm3, %v1637_v10, %v1639_v50  ;;  %v3588_v17 = vpop.permute.xlu0 %2233 }
 0x548   : > { %v1654_v14 = vsel %vm263_vm1, %v1642_v11, 0  ;;  %2871 = vmatprep.subr.msk.bf16.mxu1 %vm263_vm1, %v1643_v13  ;;  %2870 = vmatmul.mubr.msk.bf16.vlgmr.msra.gmra.mrb[40].mxu0 %vm259_vm2, %v1503_v8  ;;  %v2907_v13 = vld [vmem:[%s3802_s2 + $0x1c] sm:$0xf] }
 0x549   : > { %1701 = vmatpush1.bf16.msra.mxu1 %v1654_v14  ;;  %1804 = vmatprep.mubr.bf16.mxu0 %v3103_v0 }
 0x54a   : > { %v1744_v16 = vpop.permute.xlu1 %1743 }
 0x54b   : > { %v1753_v18 = vsel %vm482_vm4, %v1744_v16, %v1746_v54  ;;  %v2111_v24 = vpop.permute.xlu0 %2110 }
 0x54c   : > { %2872 = vmatmul.mubr.msk.bf16.vlgmr.msra.gmra.mrb[40].mxu1 %vm259_vm2, %v1503_v8  ;;  %v1761_v21 = vsel %vm263_vm1, %v1753_v18, 0 }
 0x54d   : > { %1845 = vmatprep.mubr.bf16.mxu1 %v3103_v0 }
 0x54e   : > { %v1748_v19 = vpop.permute.xlu1 %1747 }
 0x54f   : > { %v1754_v20 = vsel %vm482_vm4, %v1746_v54, %v1748_v19  ;;  %v1755_v22 = vsel %vm482_vm4, %v1748_v19, %v1750_v58  ;;  %v2115_v27 = vpop.permute.xlu0 %2114 }
 0x550   : > { %2874 = vmatprep.subr.msk.bf16.mxu0 %vm263_vm1, %v1754_v20  ;;  %v1767_v48 = vsel %vm263_vm1, %v1755_v22, 0 }
 0x551   : > { %1773 = vmatpush1.bf16.msra.mxu0 %v1761_v21 }
 0x552   : > { %v1752_v36 = vpop.permute.xlu1 %1751 }
 0x553   : > { %v1756_v38 = vsel %vm482_vm4, %v1750_v58, %v1752_v36  ;;  %v2226_v44 = vpop.permute.xlu0 %2225 }
 0x554   : > { %2875 = vmatmul.mubr.msk.bf16.vlgmr.msra.gmra.mrb[44].mxu0 %vm259_vm2, %v2873_v23  ;;  %2876 = vmatprep.subr.msk.bf16.mxu1 %vm263_vm1, %v1756_v38 }
 0x555   : > { %1814 = vmatpush1.bf16.msra.mxu1 %v1767_v48  ;;  %1921 = vmatprep.mubr.bf16.mxu0 %v3103_v0 }
 0x556   : > { %v1863_v51 = vpop.permute.xlu1 %1862 }
 0x557   : > { %v1870_v25 = vsel %vm600_vm5, %v1861_v61, %v1863_v51  ;;  %v1871_v26 = vsel %vm600_vm5, %v1863_v51, %v1865_v3  ;;  %v2230_v49 = vpop.permute.xlu0 %2229 }
 0x558   : > { %v1878_v28 = vsel %vm263_vm1, %v1870_v25, 0  ;;  %2877 = vmatmul.mubr.msk.bf16.vlgmr.msra.gmra.mrb[44].mxu1 %vm259_vm2, %v2873_v23  ;;  %2879 = vmatprep.subr.msk.bf16.mxu0 %vm263_vm1, %v1871_v26 }
 0x559   : > { %1890 = vmatpush1.bf16.msra.mxu0 %v1878_v28  ;;  %1962 = vmatprep.mubr.bf16.mxu1 %v3103_v0 }
 0x55a   : > { %2888 = vmatprep.subr.msk.bf16.mxu0 %vm263_vm1, %v3511_v39  ;;  %v1867_v30 = vpop.permute.xlu1 %1866 }
 0x55b   : > { %v1872_v32 = vsel %vm600_vm5, %v1865_v3, %v1867_v30  ;;  %v1873_v33 = vsel %vm600_vm5, %v1867_v30, %v1869_v9  ;;  %v2345_v57 = vpop.permute.xlu0 %2344 }
 0x55c   : > { %v1884_v35 = vsel %vm263_vm1, %v1872_v32, 0  ;;  %2880 = vmatmul.mubr.msk.bf16.vlgmr.msra.gmra.mrb[48].mxu0 %vm259_vm2, %v2878_v29  ;;  %2881 = vmatprep.subr.msk.bf16.mxu1 %vm263_vm1, %v1873_v33 }
 0x55d   : > { %1931 = vmatpush1.bf16.msra.mxu1 %v1884_v35  ;;  %2005 = vmatpush1.bf16.msra.mxu0 %v1993_v37 }
 0x55e   : > { %2890 = vmatprep.subr.msk.bf16.mxu1 %vm263_vm1, %v3516_v40  ;;  %v2117_v39 = vpop.permute.xlu1 %2116  ;;  %2036 = vmatprep.mubr.bf16.mxu0 %v3103_v0 }
 0x55f   : > { %v2121_v47 = vsel %vm849_vm6, %v2115_v27, %v2117_v39  ;;  %v2349_v2 = vpop.permute.xlu0 %2348 }
 0x560   : > { %2882 = vmatmul.mubr.msk.bf16.vlgmr.msra.gmra.mrb[48].mxu1 %vm259_vm2, %v2878_v29 }
 0x561   : > { %2046 = vmatpush1.bf16.msra.mxu1 %v1999_v45  ;;  %2077 = vmatprep.mubr.bf16.mxu1 %v3103_v0 }
 0x562   : > { %2900 = vmatprep.subr.msk.bf16.mxu1 %vm263_vm1, %v2121_v47  ;;  %v2109_v40 = vpop.permute.xlu1 %2108 }
 0x563   : > { %v2118_v50 = vsel %vm849_vm6, %v2109_v40, %v2111_v24  ;;  %v2460_v7 = vpop.permute.xlu0 %2459 }
 0x564   : > { %2889 = vmatmul.mubr.msk.bf16.vlgmr.msra.gmra.mrb[52].mxu0 %vm259_vm2, %v2883_v42  ;;  %v2126_v54 = vsel %vm263_vm1, %v2118_v50, 0 }
 0x565   : > { %2169 = vmatprep.mubr.bf16.mxu0 %v3103_v0 }
 0x566   : > { %v2113_v43 = vpop.permute.xlu1 %2112 }
 0x567   : > { %v2119_v52 = vsel %vm849_vm6, %v2111_v24, %v2113_v43  ;;  %v2120_v53 = vsel %vm849_vm6, %v2113_v43, %v2115_v27  ;;  %v2912_v24 = vld [vmem:[%s3802_s2 + $0x20] sm:$0xf] }
 0x568   : > { %v2132_v55 = vsel %vm263_vm1, %v2120_v53, 0  ;;  %2891 = vmatmul.mubr.msk.bf16.vlgmr.msra.gmra.mrb[52].mxu1 %vm259_vm2, %v2883_v42  ;;  %2898 = vmatprep.subr.msk.bf16.mxu0 %vm263_vm1, %v2119_v52 }
 0x569   : > { %2138 = vmatpush1.bf16.msra.mxu0 %v2126_v54  ;;  %2179 = vmatpush1.bf16.msra.mxu1 %v2132_v55 }
 0x56a   : > { %v2228_v15 = vpop.permute.xlu1 %2227  ;;  %2210 = vmatprep.mubr.bf16.mxu1 %v3103_v0 }
 0x56b   : > { %v2235_v58 = vsel %vm967_vm7, %v2226_v44, %v2228_v15  ;;  %v2236_v59 = vsel %vm967_vm7, %v2228_v15, %v2230_v49 }
 0x56c   : > { %v2243_v60 = vsel %vm263_vm1, %v2235_v58, 0  ;;  %2899 = vmatmul.mubr.msk.bf16.vlgmr.msra.gmra.mrb[56].mxu0 %vm259_vm2, %v2892_v56  ;;  %2903 = vmatprep.subr.msk.bf16.mxu0 %vm263_vm1, %v2236_v59 }
 0x56d   : > { %2255 = vmatpush1.bf16.msra.mxu0 %v2243_v60  ;;  %2286 = vmatprep.mubr.bf16.mxu0 %v3103_v0 }
 0x56e   : > { %v2232_v61 = vpop.permute.xlu1 %2231 }
 0x56f   : > { %v2237_v62 = vsel %vm967_vm7, %v2230_v49, %v2232_v61  ;;  %v2238_v63 = vsel %vm967_vm7, %v2232_v61, %v3588_v17  ;;  %v2464_v17 = vpop.permute.xlu0 %2463 }
 0x570   : > { %v2249_v3 = vsel %vm263_vm1, %v2237_v62, 0  ;;  %2901 = vmatmul.mubr.msk.bf16.vlgmr.msra.gmra.mrb[56].mxu1 %vm259_vm2, %v2892_v56  ;;  %2905 = vmatprep.subr.msk.bf16.mxu1 %vm263_vm1, %v2238_v63 }
 0x571   : > { %2296 = vmatpush1.bf16.msra.mxu1 %v2249_v3  ;;  %2327 = vmatprep.mubr.bf16.mxu1 %v3103_v0 }
 0x572   : > { %v2343_v5 = vpop.permute.xlu1 %2342 }
 0x573   : > { %v2352_v6 = vsel %vm1085_vm8, %v2343_v5, %v2345_v57  ;;  %v2468_v23 = vpop.permute.xlu0 %2467 }
 0x574   : > { %2904 = vmatmul.mubr.msk.bf16.vlgmr.msra.gmra.mrb[60].mxu0 %vm259_vm2, %v2902_v4  ;;  %v2360_v10 = vsel %vm263_vm1, %v2352_v6, 0 }
 0x575   : > { %2403 = vmatprep.mubr.bf16.mxu0 %v3103_v0 }
 0x576   : > { %v2347_v8 = vpop.permute.xlu1 %2346 }
 0x577   : > { %v2353_v9 = vsel %vm1085_vm8, %v2345_v57, %v2347_v8  ;;  %v2354_v11 = vsel %vm1085_vm8, %v2347_v8, %v2349_v2 }
 0x578   : > { %2906 = vmatmul.mubr.msk.bf16.vlgmr.msra.gmra.mrb[60].mxu1 %vm259_vm2, %v2902_v4  ;;  %2908 = vmatprep.subr.msk.bf16.mxu0 %vm263_vm1, %v2353_v9  ;;  %v2366_v18 = vsel %vm263_vm1, %v2354_v11, 0 }
 0x579   : > { %2372 = vmatpush1.bf16.msra.mxu0 %v2360_v10  ;;  %2444 = vmatprep.mubr.bf16.mxu1 %v3103_v0 }
 0x57a   : > { %v2351_v14 = vpop.permute.xlu1 %2350 }
 0x57b   : > { %v2355_v16 = vsel %vm1085_vm8, %v2349_v2, %v2351_v14 }
 0x57c   : > { %2909 = vmatmul.mubr.msk.bf16.vlgmr.msra.gmra.mrb[64].mxu0 %vm259_vm2, %v2907_v13  ;;  %2910 = vmatprep.subr.msk.bf16.mxu1 %vm263_vm1, %v2355_v16 }
 0x57d   : > { %2413 = vmatpush1.bf16.msra.mxu1 %v2366_v18  ;;  %2520 = vmatprep.mubr.bf16.mxu0 %v3103_v0 }
 0x57e   : > { %v2462_v19 = vpop.permute.xlu1 %2461 }
 0x57f   : > { %v2469_v20 = vsel %vm1203_vm9, %v2460_v7, %v2462_v19  ;;  %v2470_v21 = vsel %vm1203_vm9, %v2462_v19, %v2464_v17 }
 0x580   : > { %v2477_v22 = vsel %vm263_vm1, %v2469_v20, 0  ;;  %2911 = vmatmul.mubr.msk.bf16.vlgmr.msra.gmra.mrb[64].mxu1 %vm259_vm2, %v2907_v13  ;;  %2913 = vmatprep.subr.msk.bf16.mxu0 %vm263_vm1, %v2470_v21 }
 0x581   : > { %2489 = vmatpush1.bf16.msra.mxu0 %v2477_v22  ;;  %2561 = vmatprep.mubr.bf16.mxu1 %v3103_v0 }
 0x582   : > { %v2466_v36 = vpop.permute.xlu1 %2465 }
 0x583   : > { %v2471_v38 = vsel %vm1203_vm9, %v2464_v17, %v2466_v36  ;;  %v2472_v48 = vsel %vm1203_vm9, %v2466_v36, %v2468_v23 }
 0x584   : > { %v2483_v51 = vsel %vm263_vm1, %v2471_v38, 0  ;;  %2914 = vmatmul.mubr.msk.bf16.vlgmr.msra.gmra.mrb[68].mxu0 %vm259_vm2, %v2912_v24  ;;  %2915 = vmatprep.subr.msk.bf16.mxu1 %vm263_vm1, %v2472_v48 }
 0x585   : > { %2530 = vmatpush1.bf16.msra.mxu1 %v2483_v51 }
 0x588   : > { %2916 = vmatmul.mubr.msk.bf16.vlgmr.msra.gmra.mrb[68].mxu1 %vm259_vm2, %v2912_v24 }
 0x60b   : > { %v1582_v25 = vpop.f32.mrb[36].mxu0 }
 0x60c   : > { %v1584_v26 = vpop.f32.mrb[37].mxu0 }
 0x60d   : > { %v1586_v27 = vpop.f32.mrb[38].mxu0 }
 0x60e   : > { %v1587_v28 = vpop.f32.mrb[39].mxu0 }
 0x613   : > { %v1623_v29 = vpop.f32.mrb[36].mxu1 }
 0x614   : > { %v1625_v0 = vpop.f32.mrb[37].mxu1 }
 0x615   : > { %v1627_v30 = vpop.f32.mrb[38].mxu1 }
 0x616   : > { %v1628_v32 = vpop.f32.mrb[39].mxu1 }
 0x61b   : > { %v1693_v33 = vpop.f32.mrb[40].mxu0 }
 0x61c   : > { %v1694_v35 = vadd.f32 %v1693_v33, %v1582_v25  ;;  %v1695_v37 = vpop.f32.mrb[41].mxu0 }
 0x61d   : > { %v1696_v44 = vadd.f32 %v1695_v37, %v1584_v26  ;;  %v1697_v39 = vpop.f32.mrb[42].mxu0 }
 0x61e   : > { %v1698_v45 = vpop.f32.mrb[43].mxu0 }
 0x61f   : > { %v1734_v47 = vpop.f32.mrb[40].mxu1 }
 0x620   : > { %v1735_v42 = vadd.f32 %v1734_v47, %v1623_v29  ;;  %v1736_v40 = vpop.f32.mrb[41].mxu1 }
 0x621   : > { %v1737_v49 = vadd.f32 %v1736_v40, %v1625_v0  ;;  %v1738_v50 = vpop.f32.mrb[42].mxu1 }
 0x622   : > { %v1739_v43 = vpop.f32.mrb[43].mxu1 }
 0x627   : > { %v1806_v52 = vpop.f32.mrb[44].mxu0 }
 0x628   : > { %v1854_v53 = vadd.f32 %v1806_v52, %v1694_v35  ;;  %v1808_v54 = vpop.f32.mrb[45].mxu0 }
 0x629   : > { %v1855_v55 = vadd.f32 %v1808_v54, %v1696_v44  ;;  %v1810_v56 = vpop.f32.mrb[46].mxu0 }
 0x62a   : > { %v1811_v57 = vpop.f32.mrb[47].mxu0 }
 0x62b   : > { %v1847_v15 = vpop.f32.mrb[44].mxu1 }
 0x62c   : > { %v1856_v58 = vadd.f32 %v1847_v15, %v1735_v42  ;;  %v1849_v59 = vpop.f32.mrb[45].mxu1 }
 0x62d   : > { %v1857_v60 = vadd.f32 %v1849_v59, %v1737_v49  ;;  %v1851_v61 = vpop.f32.mrb[46].mxu1 }
 0x62e   : > { %v1852_v62 = vpop.f32.mrb[47].mxu1 }
 0x62f   : > { %v1923_v63 = vpop.f32.mrb[48].mxu0 }
 0x630   : > { %v1971_v2 = vadd.f32 %v1923_v63, %v1854_v53  ;;  %v1925_v3 = vpop.f32.mrb[49].mxu0 }
 0x631   : > { %v1972_v4 = vadd.f32 %v1925_v3, %v1855_v55  ;;  %v1927_v5 = vpop.f32.mrb[50].mxu0 }
 0x632   : > { %v1928_v6 = vpop.f32.mrb[51].mxu0 }
 0x633   : > { %v1964_v7 = vpop.f32.mrb[48].mxu1 }
 0x634   : > { %v1973_v8 = vadd.f32 %v1964_v7, %v1856_v58  ;;  %v1966_v9 = vpop.f32.mrb[49].mxu1 }
 0x635   : > { %v1974_v10 = vadd.f32 %v1966_v9, %v1857_v60  ;;  %v1968_v11 = vpop.f32.mrb[50].mxu1 }
 0x636   : > { %v1969_v13 = vpop.f32.mrb[51].mxu1 }
 0x637   : > { %v2038_v14 = vpop.f32.mrb[52].mxu0 }
 0x638   : > { %v2086_v16 = vadd.f32 %v2038_v14, %v1971_v2  ;;  %v2040_v17 = vpop.f32.mrb[53].mxu0 }
 0x639   : > { %v2087_v18 = vadd.f32 %v2040_v17, %v1972_v4  ;;  %v2042_v19 = vpop.f32.mrb[54].mxu0  ;;  %v2578_v4 = vpop.permute.xlu1 %2577 }
 0x63a   : > { %v2043_v20 = vpop.f32.mrb[55].mxu0 }
 0x63b   : > { %v2079_v21 = vpop.f32.mrb[52].mxu1 }
 0x63c   : > { %v2088_v22 = vadd.f32 %v2079_v21, %v1973_v8  ;;  %v2081_v23 = vpop.f32.mrb[53].mxu1 }
 0x63d   : > { %v2089_v24 = vadd.f32 %v2081_v23, %v1974_v10  ;;  %v2083_v36 = vpop.f32.mrb[54].mxu1 }
 0x63e   : > { %v2084_v38 = vpop.f32.mrb[55].mxu1 }
 0x63f   : > { %v2171_v48 = vpop.f32.mrb[56].mxu0 }
 0x640   : > { %v2219_v51 = vadd.f32 %v2171_v48, %v2086_v16  ;;  %v2173_v25 = vpop.f32.mrb[57].mxu0 }
 0x641   : > { %v2220_v26 = vadd.f32 %v2173_v25, %v2087_v18  ;;  %v2175_v27 = vpop.f32.mrb[58].mxu0 }
 0x642   : > { %v2176_v28 = vpop.f32.mrb[59].mxu0 }
 0x643   : > { %v2212_v29 = vpop.f32.mrb[56].mxu1 }
 0x644   : > { %v2221_v0 = vadd.f32 %v2212_v29, %v2088_v22  ;;  %v2214_v30 = vpop.f32.mrb[57].mxu1 }
 0x645   : > { %v2222_v32 = vadd.f32 %v2214_v30, %v2089_v24  ;;  %v2216_v33 = vpop.f32.mrb[58].mxu1 }
 0x646   : > { %v2217_v35 = vpop.f32.mrb[59].mxu1 }
 0x647   : > { %v2288_v37 = vpop.f32.mrb[60].mxu0 }
 0x648   : > { %v2336_v44 = vadd.f32 %v2288_v37, %v2219_v51  ;;  %v2290_v39 = vpop.f32.mrb[61].mxu0 }
 0x649   : > { %v2337_v45 = vadd.f32 %v2290_v39, %v2220_v26  ;;  %v2292_v47 = vpop.f32.mrb[62].mxu0 }
 0x64a   : > { %v2293_v42 = vpop.f32.mrb[63].mxu0 }
 0x64b   : > { %v2329_v40 = vpop.f32.mrb[60].mxu1 }
 0x64c   : > { %v2338_v49 = vadd.f32 %v2329_v40, %v2221_v0  ;;  %v2331_v50 = vpop.f32.mrb[61].mxu1 }
 0x64d   : > { %v2339_v43 = vadd.f32 %v2331_v50, %v2222_v32  ;;  %v2333_v52 = vpop.f32.mrb[62].mxu1 }
 0x64e   : > { %v2334_v53 = vpop.f32.mrb[63].mxu1 }
 0x64f   : > { %v2405_v54 = vpop.f32.mrb[64].mxu0 }
 0x650   : > { %v2453_v55 = vadd.f32 %v2405_v54, %v2336_v44  ;;  %v2407_v56 = vpop.f32.mrb[65].mxu0 }
 0x651   : > { %v2454_v57 = vadd.f32 %v2407_v56, %v2337_v45  ;;  %v2409_v15 = vpop.f32.mrb[66].mxu0 }
 0x652   : > { %v2410_v58 = vpop.f32.mrb[67].mxu0 }
 0x653   : > { %v2446_v59 = vpop.f32.mrb[64].mxu1 }
 0x654   : > { %v2455_v60 = vadd.f32 %v2446_v59, %v2338_v49  ;;  %v2448_v61 = vpop.f32.mrb[65].mxu1 }
 0x655   : > { %v2456_v62 = vadd.f32 %v2448_v61, %v2339_v43  ;;  %v2450_v63 = vpop.f32.mrb[66].mxu1 }
 0x656   : > { %v2451_v2 = vpop.f32.mrb[67].mxu1 }
 0x657   : > { %v2522_v3 = vpop.f32.mrb[68].mxu0 }
 0x658   : > { %v2570_v5 = vadd.f32 %v2522_v3, %v2453_v55  ;;  %v2524_v6 = vpop.f32.mrb[69].mxu0 }
 0x659   : > { %v2571_v7 = vadd.f32 %v2524_v6, %v2454_v57  ;;  %v2526_v8 = vpop.f32.mrb[70].mxu0 }
 0x65a   : > { %v3696_v9 = vadd.f32 %v2578_v4, %v2570_v5  ;;  %v2527_v10 = vpop.f32.mrb[71].mxu0 }
 0x65b   : > { %v3698_v11 = vadd.f32 %v2578_v4, %v2571_v7  ;;  %v2563_v13 = vpop.f32.mrb[68].mxu1 }
 0x65c   : > { %v2572_v14 = vadd.f32 %v2563_v13, %v2455_v60  ;;  %v2565_v16 = vpop.f32.mrb[69].mxu1  ;;  %v2584_v17 = vmul.f32 %v3696_v9, %v3427_v31 }
 0x65d   : > { %v2573_v18 = vadd.f32 %v2565_v16, %v2456_v62  ;;  %v2567_v19 = vpop.f32.mrb[70].mxu1  ;;  %v2585_v20 = vmul.f32 %v3698_v11, %v3429_v34 }
 0x65e   : > { %v3704_v21 = vadd.f32 %v2578_v4, %v2572_v14  ;;  %v2568_v22 = vpop.f32.mrb[71].mxu1  ;;  %v2593_v23 = vmul.f32 %v2584_v17, %v2584_v17 }
 0x65f   : > { %v3706_v24 = vadd.f32 %v2578_v4, %v2573_v18  ;;  %v2588_v36 = vadd.f32 %v2585_v20, %v2584_v17  ;;  %v2594_v38 = vmul.f32 %v2585_v20, %v2585_v20  ;;  %v3115_v17 = vmov 4  }
 0x660   : > { %v2586_v48 = vmul.f32 %v3704_v21, %v3436_v41  ;;  %3007 = vset.pattern.permute.xlu0 %v3115_v17 }
 0x661   : > { %v2587_v51 = vmul.f32 %v3706_v24, %v3440_v46  ;;  %v2597_v25 = vadd.f32 %v2594_v38, %v2593_v23 }
 0x662   : > { %v2595_v26 = vmul.f32 %v2586_v48, %v2586_v48  ;;  %v2589_v27 = vadd.f32 %v2588_v36, %v2586_v48 }
 0x663   : > { %v2596_v28 = vmul.f32 %v2587_v51, %v2587_v51 }
 0x664   : > { %v2590_v29 = vadd.f32 %v2589_v27, %v2587_v51  ;;  %v2598_v0 = vadd.f32 %v2597_v25, %v2595_v26  ;;  %v3116_v25 = vmov 5  }
 0x665   : > { %3008 = vset.pattern.permute.xlu1 %v3116_v25 }
 0x666   : > { %2591 = vadd.xlane.f32.xlu0 %v2590_v29  ;;  %v2599_v30 = vadd.f32 %v2598_v0, %v2596_v28  ;;  %v3034_v0 = vld [vmem:[%s3803_s3] sm:$0xff] }
 0x668   : > { %2600 = vadd.xlane.f32.xlu1 %v2599_v30 }
 0x6f3   : > { %v2592_v32 = vpop.xlane.xlu0 %2591 }
 0x6f4   : > { %v2640_v33 = vsel %vm3455_vm13, %v2592_v32, 0.0  ;;  %v2602_v35 = vsel %vm1361_vm12, %v2592_v32, 0.0 }
 0x6f5   : > { %v2601_v37 = vpop.xlane.xlu1 %2600  ;;  %v2641_v44 = vsel %vm600_vm5, %v2640_v33, 0.0  ;;  %v2603_v39 = vsel %vm600_vm5, %v2602_v35, 0.0 }
 0x6f6   : > { %2642 = vadd.xlane.f32.xlu1 %v2641_v44  ;;  %2604 = vadd.xlane.f32.xlu0 %v2603_v39  ;;  %v2613_v45 = vsel %vm1361_vm12, %v2601_v37, 0.0  ;;  %v2651_v42 = vsel %vm3455_vm13, %v2601_v37, 0.0 }
 0x6f7   : > { %v2614_v47 = vsel %vm600_vm5, %v2613_v45, 0.0  ;;  %v2652_v40 = vsel %vm600_vm5, %v2651_v42, 0.0 }
 0x6fa   : > { %2615 = vadd.xlane.f32.xlu0 %v2614_v47 }
 0x6fe   : > { %2653 = vadd.xlane.f32.xlu0 %v2652_v40 }
 0x783   : > { %v2605_v49 = vpop.xlane.xlu0 %2604  ;;  %v2643_v62 = vpop.xlane.xlu1 %2642 }
 0x784   : > { %v2606_v50 = vrot.slane %v2605_v49, 4  ;;  %v2644_v2 = vrot.slane %v2643_v62, 4 }
 0x786   : > { %v2607_v43 = vadd.f32 %v2606_v50, %v2605_v49  ;;  %v2645_v4 = vadd.f32 %v2644_v2, %v2643_v62 }
 0x787   : > { %v2616_v52 = vpop.xlane.xlu0 %2615 }
 0x788   : > { %v2608_v53 = vrot.slane %v2607_v43, 2  ;;  %v2617_v54 = vrot.slane %v2616_v52, 4  ;;  %v2646_v6 = vrot.slane %v2645_v4, 2 }
 0x78a   : > { %v2618_v55 = vadd.f32 %v2617_v54, %v2616_v52  ;;  %v2609_v56 = vadd.f32 %v2608_v53, %v2607_v43  ;;  %v2647_v10 = vadd.f32 %v2646_v6, %v2645_v4 }
 0x78b   : > { %v2654_v63 = vpop.xlane.xlu0 %2653 }
 0x78c   : > { %v2619_v57 = vrot.slane %v2618_v55, 2  ;;  %v2610_v15 = vrot.slane %v2609_v56, 1  ;;  %v2655_v3 = vrot.slane %v2654_v63, 4  ;;  %v2648_v14 = vrot.slane %v2647_v10, 1 }
 0x78e   : > { %v2611_v58 = vadd.f32 %v2610_v15, %v2609_v56  ;;  %v2620_v59 = vadd.f32 %v2619_v57, %v2618_v55  ;;  %v2656_v5 = vadd.f32 %v2655_v3, %v2654_v63  ;;  %v2649_v19 = vadd.f32 %v2648_v14, %v2647_v10 }
 0x790   : > { %2938 = vpush %v2611_v58  ;;  %v2621_v60 = vrot.slane %v2620_v59, 1  ;;  %v2657_v7 = vrot.slane %v2656_v5, 2 }
 0x792   : > { %v2622_v61 = vadd.f32 %v2621_v60, %v2620_v59  ;;  %v2658_v13 = vadd.f32 %v2657_v7, %v2656_v5 }
 0x794   : > { %2940 = vpush %v2622_v61  ;;  %v2659_v16 = vrot.slane %v2658_v13, 1 }
 0x796   : > { %v2660_v20 = vadd.f32 %v2659_v16, %v2658_v13 }
 0x7c1   : > { %s2939_s15 = spop %2938 }
 0x7c2   : > { %s3724_s16 = smul.f32 0.001953125, %s2939_s15 }
 0x7c4   : > { %s2630_s17 = smul.f32 %s3724_s16, %s3724_s16  ;;  %v2636_v22 = vstv %s3724_s16 }
 0x7c5   : > { %s2941_s7 = spop %2940  ;;  %v2637_v23 = vsel %vm1361_vm12, %v2636_v22, 0.0 }
 0x7c6   : > { %s2629_s8 = smul.f32 0.001953125, %s2941_s7  ;;  %s215_s7 = sand.u32 1, %s3093_s19  }
 0x7c8   : > { %s2631_s23 = ssub.f32 %s2629_s8, %s2630_s17  ;;  %s2797_s8 = sshll.u32 %s215_s7, 5 }
 0x7ca   : > { %s2632_s25 = sadd.f32 1e-05, %s2631_s23  ;;  %s217_s23 = scalar_lea.vmem [#allocation3], %s2797_s8 }
 0x7cc   : > { %v2633_v8 = vstv %s2632_s25  ;;  %s2734_s25 = sshll.u32 %s217_s23, 4  ;;  %s3758_s25 = int_to_ptr.vmem [resolvable:$true] %s2734_s25 }
 0x7cd   : > { %3030 = vrsqrt.f32 %v2633_v8 }
 0x7d7   : > { %v3031_v18 = vpop.eup %3030 }
 0x7d8   : > { %2942 = vpush %v3031_v18 }
 0x7d9   : > { %2944 = vpush %v2649_v19 }
 0x7da   : > { %2946 = vpush %v2660_v20 }
 0x809   : > { %s2943_s26 = spop %2942 }
 0x80a   : > { %s2945_s30 = spop %2944  ;;  %v2638_v26 = vstv %s2943_s26 }
 0x80b   : > { %s2664_s6 = smul.f32 0.001953125, %s2945_s30  ;;  %s2947_s9 = spop %2946  ;;  %v2639_v27 = vsel %vm1361_vm12, %v2638_v26, 0.0 }
 0x80c   : > { %s2667_s10 = smul.f32 0.001953125, %s2947_s9  ;;  %s3039_s9 = scalar_lea.vmem %s3758_s25, 512 }
 0x80d   : > { %s2668_s11 = smul.f32 %s2664_s6, %s2664_s6  ;;  %v2674_v36 = vstv %s2664_s6  ;;  %p3040_p11 = scmp.ne.s32.totalorder %s3758_s25, %s3039_s9 }
 0x80e   : > { %v2675_v38 = vsel %vm3455_vm13, %v2674_v36, %v2637_v23 }
 0x80f   : > { %s2669_s12 = ssub.f32 %s2667_s10, %s2668_s11  ;;  %p3041_p12 = pnand %p3040_p11, %p3186_p5 }
 0x810   : > { %s3117_s10 = smov [#allocation3]  }
 0x811   : > { %s2670_s14 = sadd.f32 1e-05, %s2669_s12  ;;  %p3042_p13 = pneg %p3041_p12 }
 0x812   : > { %s3043_s11 = sshll.u32 %s3117_s10, 4  ;;  %s3044_s11 = int_to_ptr.vmem [resolvable:$false] %s3043_s11 }
 0x813   : > { %v2671_v48 = vstv %s2670_s14  ;;  %s3045_s12 = scalar_lea.vmem %s3044_s11, 1024  ;;  %p3046_p0 = scmp.lt.s32.totalorder %s3758_s25, %s3044_s11 }
 0x814   : > { %3032 = vrsqrt.f32 %v2671_v48  ;;  %p3047_p1 = scmp.lt.s32.totalorder %s3045_s12, %s3039_s9 }
 0x816   : > { %p3048_p2 = por %p3047_p1, %p3046_p0 }
 0x818   : > { %p3049_p3 = pnand %p3048_p2, %p3042_p13 }
 0x81e   : > { %v3033_v51 = vpop.eup %3032 }
 0x81f   : > { %2948 = vpush %v3033_v51 }
 0x850   : > { %s2949_s15 = spop %2948 }
 0x851   : > { %v2676_v28 = vstv %s2949_s15 }
 0x852   : > { %v2677_v29 = vsel %vm3455_vm13, %v2676_v28, %v2639_v27 }
 0x853   : > { %v2678_v30 = vmul.f32 %v3034_v0, %v2677_v29 }
 0x855   : > { %v2679_v32 = vmul.f32 %v2678_v30, %v2675_v38  ;;  %2687 = vperm.xlu0 %3007, %v2678_v30  }
 0x857   : > { %2681 = vrot.lane.b32.xlu1 %v2679_v32, %s3107_s13  ;;  %s2924_s13 = sshll.u32 %s3169_s22, 9  ;;  %s2720_s22 = scalar_lea.sflag [#allocation4], %s215_s7 }
 0x858   : > { %s3756_s6 = scalar_lea.hbm %s3805_s5, %s2924_s13 }
 0x859   : > { %3009 = vset.pattern.permute.xlu0 %v3116_v25 }
 0x8c9   : > { %v2682_v33 = vpop.permute.xlu1 %2681 }
 0x8ca   : > { %v2684_v35 = vsub.f32 %v3034_v0, %v2682_v33 }
 0x8cc   : > { %2696 = vperm.xlu1 %3008, %v2684_v35  }
 0x8d4   : > { %v2688_v12 = vpop.permute.xlu0 %2687 }
 0x8d5   : > { %v2690_v37 = vmul.f32 %v2688_v12, %v3696_v9  ;;  %v2691_v1 = vmul.f32 %v2688_v12, %v3698_v11  ;;  %v2692_v44 = vmul.f32 %v2688_v12, %v3704_v21  ;;  %v2693_v39 = vmul.f32 %v2688_v12, %v3706_v24 }
 0x94b   : > { %v2697_v45 = vpop.permute.xlu1 %2696 }
 0x94c   : > { %v2699_v47 = vadd.f32 %v2697_v45, %v2690_v37  ;;  %v2700_v42 = vadd.f32 %v2697_v45, %v2691_v1  ;;  %v2701_v40 = vadd.f32 %v2697_v45, %v2692_v44  ;;  %v2702_v49 = vadd.f32 %v2697_v45, %v2693_v39 }
 0x94e   : > { %v2703_v50 = vmul.f32 0.2, %v2699_v47  ;;  %v2704_v43 = vmul.f32 0.2, %v2700_v42  ;;  %v2705_v52 = vmul.f32 0.2, %v2701_v40 }
 0x94f   : > { %v2706_v53 = vmul.f32 0.2, %v2702_v49 }
 0x950   : > { %v2707_v54 = vmax.f32 %v2699_v47, %v2703_v50  ;;  %v2708_v9 = vmax.f32 %v2700_v42, %v2704_v43  ;;  %v2709_v11 = vmax.f32 %v2701_v40, %v2705_v52 }
 0x951   : > { %v2710_v21 = vmax.f32 %v2702_v49, %v2706_v53 }
 0x952   : > { %v2711_v24 = vmul.f32 %v2707_v54, %v3427_v31  ;;  %v2712_v55 = vmul.f32 %v2708_v9, %v3429_v34  ;;  %v2713_v56 = vmul.f32 %v2709_v11, %v3436_v41 }
 0x953   : > { %v2714_v57 = vmul.f32 %v2710_v21, %v3440_v46 }
 0x954   : > { %2715 = vst [vmem:[%s217_s23] sm:$0xff] %v2711_v24  ;;  %2716 = vst [vmem:[%s217_s23 + $0x8] sm:$0xff] %v2712_v55 }
 0x955   : > { %2717 = vst [vmem:[%s217_s23 + $0x10] sm:$0xff] %v2713_v56  ;;  %2718 = vst [vmem:[%s217_s23 + $0x18] sm:$0xff] %v2714_v57 }
 0x956   : > { %3052 = shalt.err (!%p3049_p3)
}
 0x957   : > { %s3053_s14 = scalar_lea.hbm %s3756_s6, 512  ;;  %s3057_s17 = scalar_lea.hbm %s3805_s5, 1024 }
 0x958   : > { %p3054_p4 = scmp.ne.s32.totalorder %s3756_s6, %s3053_s14  ;;  %p3058_p9 = scmp.lt.u32.totalorder %s3756_s6, %s3805_s5 }
 0x959   : > { %p3059_p10 = scmp.lt.u32.totalorder %s3057_s17, %s3053_s14  ;;  %p3061_p12 = scmp.lt.u32.totalorder %s3053_s14, %s3756_s6 }
 0x95a   : > { %p3055_p7 = pnand %p3054_p4, %p3186_p5 }
 0x95b   : > { %p3060_p11 = por %p3059_p10, %p3058_p9 }
 0x95c   : > { %p3056_p8 = pneg %p3055_p7 }
 0x95d   : > { %p3062_p13 = por %p3061_p12, %p3060_p11 }
 0x95f   : > { %p3063_p0 = pnand %p3062_p13, %p3056_p8 }
 0x961   : > { %3066 = shalt.err (!%p3063_p0)
}
 0x962   : > { %2950 = dma.vmem_to_hbm [thread:$0]  (%p3186_p5), %s3758_s25, 512, %s3756_s6, %s2720_s22  }
 0x963 PF: > { %p2956_p1 = scmp.ge.s32.totalorder %s3101_s21, 2  ;;  %s2746_s13 = sand.u32 1, %s3089_s18  }
 0x964   : > { %s2747_s23 = scalar_lea.sflag [#allocation4], %s2746_s13 }
 0x965   : > { %p2953_p2 = pnand %p2956_p1, %p3190_p6 }
 0x967   : > { %3084 = dma.done.wait (!%p2953_p2), %s2747_s23, 512  }
 0x968   : > { %3086 = vsyncadd (!%p2953_p2), %s2747_s23, 4294966784  ;;  %p15_p3 = scmp.ge.s32.totalorder %s3173_s24, 4   ;;  %s3813_s18 = smov %s3093_s19 }
 0x969   : > { %s3814_s19 = smov %s3097_s20  ;;  %s3815_s20 = smov %s3184_s27 }
 0x96a   : > { %s3816_s21 = smov %s3173_s24  ;;  %17 = sbr.rel (!%p15_p3) target bundleno = 3 (0x3), region = 91 }
 0x971   :  { %2752 = vsyncpa [#allocation4], 1 }
 0x972   :  { %2754 = vsyncpa [#allocation4 + $0x1], 1 }

</bundles_post_ra>
